<compile_context>
chip_gen: v6e
topology: v6e:2x2x1
jax: 0.10.0
libtpu: 0.0.40
codegen_flags: <defaults>
</compile_context>

<pallas_src>
import functools

import numpy as np

import jax
import jax.numpy as jnp
from jax import lax
from jax.experimental import pallas as pl
from jax.experimental.pallas import tpu as pltpu


# ----------------------------------------------------------------------------
# Window partition / reverse glue (pure reshape/transpose, stays in XLA).
# ----------------------------------------------------------------------------
def window_partition_jax(x, window_size, index):
    if index == 0:
        h_size, w_size = window_size[0], window_size[1]
    else:
        h_size, w_size = window_size[1], window_size[0]
    if x.ndim == 5:
        two, B, H, W, C = x.shape
        x = x.reshape(2, B, H // h_size, h_size, W // w_size, w_size, C)
        return x.transpose(0, 1, 2, 4, 3, 5, 6).reshape(2, -1, h_size, w_size, C)
    B, H, W, C = x.shape
    x = x.reshape(B, H // h_size, h_size, W // w_size, w_size, C)
    return x.transpose(0, 1, 3, 2, 4, 5).reshape(-1, h_size, w_size, C)


def window_reverse_jax(windows, window_size, H, W, index):
    if index == 0:
        Hw, Ww = window_size[0], window_size[1]
    else:
        Hw, Ww = window_size[1], window_size[0]
    B = windows.shape[0] // (H * W // Hw // Ww)
    x = windows.reshape(B, H // Hw, W // Ww, Hw, Ww, -1)
    return x.transpose(0, 1, 3, 2, 4, 5).reshape(B, H, W, -1)


# ----------------------------------------------------------------------------
# Precomputed 0/1 shift matrices for the lepe depthwise 3x3 conv.
#   S[t] @ v_flat == v shifted by (di, dj) in the (Hw, Ww) window with zero
#   padding at the window border, where t = (di + 1) * 3 + (dj + 1).
# ----------------------------------------------------------------------------
@functools.lru_cache(maxsize=None)
def _lepe_shift_matrices(Hw, Ww):
    N = Hw * Ww
    idx = np.arange(N)
    i, j = idx // Ww, idx % Ww
    S = np.zeros((9, N, N), np.float32)
    for di in (-1, 0, 1):
        for dj in (-1, 0, 1):
            t = (di + 1) * 3 + (dj + 1)
            ii, jj = i + di, j + dj
            ok = (ii >= 0) & (ii < Hw) & (jj >= 0) & (jj < Ww)
            S[t, idx[ok], (ii * Ww + jj)[ok]] = 1.0
    return S


# ----------------------------------------------------------------------------
# Fused Pallas kernel: lepe depthwise conv + masked multi-head attention.
# ----------------------------------------------------------------------------
def _fused_attn_kernel(*refs, num_heads, nW_mask, blocks_per_img, has_mask):
    if has_mask:
        mask_ref, shift_ref, q_ref, k_ref, v_ref, w_ref, b_ref, o_ref = refs
    else:
        shift_ref, q_ref, k_ref, v_ref, w_ref, b_ref, o_ref = refs
        mask_ref = None

    WB, N, C = q_ref.shape
    hd = C // num_heads

    v_bf = v_ref[...]                                   # (WB, N, C) bf16

    # --- lepe: depthwise 3x3 conv as 9 shift-matrix matmuls on the MXU ------
    # No padded v copy is DMA'd and no unaligned sublane slices are
    # materialized; the border zero-padding is baked into the 0/1 matrices.
    lepe = jnp.zeros((WB, N, C), jnp.float32)
    for t in range(9):
        s_mat = jnp.broadcast_to(shift_ref[t][None], (WB, N, N))   # bf16 0/1
        shifted = jnp.einsum("wnm,wmc->wnc", s_mat, v_bf,
                             preferred_element_type=jnp.float32)
        lepe = lepe + shifted * w_ref[t].astype(jnp.float32)[None, None, :]
    lepe = lepe + b_ref[0].astype(jnp.float32)[None, None, :]

    # --- additive attention mask for this block's WB windows (f32) ----------
    if has_mask:
        if nW_mask > WB:
            start = pl.multiple_of(
                (pl.program_id(0) % blocks_per_img) * WB, WB)
            m = mask_ref[pl.ds(start, WB), :, :].astype(jnp.float32)
        else:                                   # nW_mask == WB or nW_mask == 1
            m = mask_ref[...].astype(jnp.float32)

    # --- multi-head attention: bf16 MXU operands, f32 softmax math ----------
    # (softmax scale is already folded into q in the wrapper)
    q_all = q_ref[...]
    k_all = k_ref[...]
    outs = []
    for h in range(num_heads):
        sl = slice(h * hd, (h + 1) * hd)
        s = jnp.einsum("wnd,wmd->wnm", q_all[:, :, sl], k_all[:, :, sl],
                       preferred_element_type=jnp.float32)
        if has_mask:
            s = s + m
        s = s - jnp.max(s, axis=-1, keepdims=True)
        e = jnp.exp(s)                                          # EUP
        denom = jnp.sum(e, axis=-1, keepdims=True)              # XLU reduce
        # Normalize AFTER the PV matmul: WB*N*hd multiplies instead of WB*N*N.
        o_h = jnp.einsum("wnm,wmd->wnd", e.astype(jnp.bfloat16),
                         v_bf[:, :, sl], preferred_element_type=jnp.float32)
        o_h = o_h * pl.reciprocal(denom, approx=True)
        if hd % 128 == 0:
            # Aligned 128-lane slab: store each head directly, skip the concat.
            o_ref[:, :, sl] = (o_h + lepe[:, :, sl]).astype(o_ref.dtype)
        else:
            outs.append(o_h)

    if hd % 128 != 0:
        out = jnp.concatenate(outs, axis=-1) + lepe     # (WB, N, C) lane-dense
        o_ref[...] = out.astype(o_ref.dtype)


# ----------------------------------------------------------------------------
# VMEM-aware block sizing (consistent budget / vmem_limit_bytes).
# ----------------------------------------------------------------------------
def _vmem_budget_and_limit():
    cap = None
    try:
        info = pltpu.get_tpu_info()
        cap = getattr(info, "vmem_capacity_bytes", None)
    except Exception:
        cap = None
    if not cap or cap <= 0:
        # Unknown part: conservative numbers that are safe on every generation.
        return 16 * 1024 * 1024, 32 * 1024 * 1024
    budget = int(cap * 3 // 4)   # ~48 MiB on v7x (64 MiB), ~96 MiB on v5e/v6e
    return budget, budget


def _block_bytes_per_window(N, C, in_bytes, out_bytes):
    # Double-buffered q/k/v (bf16) + output (x dtype) blocks, plus the f32
    # in-kernel temporaries (lepe accumulator, per-tap shifted block, per-head
    # s / e logits, head outputs, final concat) -- generous estimate.
    io = 2 * (3 * N * C * in_bytes + N * C * out_bytes)
    temps = 5 * N * C * 4 + 3 * N * N * 4
    return io + temps


def _const_bytes(nW_mask, N, C, mask_bytes):
    # Double-buffered resident blocks: mask, shift matrices, lepe weight/bias.
    return 2 * (nW_mask * N * N * mask_bytes + 9 * N * N * 2 + 10 * C * 4)


def _pick_window_block(B_, nW_mask, per_window, const_bytes, budget):
    fits = [d for d in range(1, B_ + 1)
            if B_ % d == 0
            and (nW_mask <= 1 or nW_mask % d == 0)
            and const_bytes + d * per_window <= budget]
    if not fits:
        return 1
    # Prefer a grid of >= 4 steps (>= 2 pipelined steps on each of v7x's two
    # TensorCores); fall back to >= 2 steps, then to the largest block.
    for min_grid in (4, 2):
        pref = [d for d in fits if B_ // d >= min_grid]
        if pref:
            return max(pref)
    return max(fits)


# ----------------------------------------------------------------------------
# Full forward (glue + fused Pallas kernel).
# ----------------------------------------------------------------------------
def window_attention_forward(x, mask, lepe_wgt, lepe_bias, *,
                             window_size, num_heads, index=0, qk_scale=None):
    # x: (3, B, H, W, C) stacked (q, k, v) feature maps.
    # lepe_wgt: (3, 3, C) depthwise conv weight (torch (C,1,3,3) -> HWC).
    qk, v = x[:2], x[2]
    B, H, W, C = v.shape
    hd = C // num_heads
    scale = qk_scale if qk_scale is not None else hd ** (-0.5)

    qk_win = window_partition_jax(qk, window_size, index)       # (2, B_, Hw, Ww, C)
    _, B_, Hw, Ww, _ = qk_win.shape
    N = Hw * Ww

    # bf16 at the kernel boundary (halves DMA bytes / VMEM); the converts and
    # the q * scale fold fuse into the window-partition copy XLA already makes.
    cdt = jnp.bfloat16
    q = (qk_win[0].reshape(B_, N, C) * jnp.float32(scale)).astype(cdt)
    k = qk_win[1].reshape(B_, N, C).astype(cdt)
    v_flat = window_partition_jax(v, window_size, index).reshape(B_, N, C).astype(cdt)

    shift_mats = jnp.asarray(_lepe_shift_matrices(Hw, Ww), dtype=cdt)  # (9, N, N)
    w9 = lepe_wgt.reshape(9, C).astype(jnp.float32)
    b1 = lepe_bias.reshape(1, C).astype(jnp.float32)

    has_mask = mask is not None
    if has_mask:
        mask_arr = mask.astype(cdt)          # {0, -100} values are exact in bf16
        nW_mask = mask_arr.shape[0]
        assert B_ % nW_mask == 0, (B_, nW_mask)
    else:
        mask_arr = None
        nW_mask = 1

    budget, vmem_limit = _vmem_budget_and_limit()
    per_window = _block_bytes_per_window(
        N, C, jnp.dtype(cdt).itemsize, jnp.dtype(x.dtype).itemsize)
    const_b = _const_bytes(nW_mask if has_mask else 0, N, C,
                           jnp.dtype(cdt).itemsize)
    wb = _pick_window_block(B_, nW_mask if has_mask else 1,
                            per_window, const_b, budget)
    blocks_per_img = max(1, nW_mask // wb)

    kernel = functools.partial(
        _fused_attn_kernel, num_heads=num_heads, nW_mask=nW_mask,
        blocks_per_img=blocks_per_img, has_mask=has_mask)

    in_specs = []
    operands = []
    if has_mask:
        # VMEM-resident (constant block index): DMA'd once, sliced in-kernel.
        in_specs.append(pl.BlockSpec((nW_mask, N, N), lambda b: (0, 0, 0)))
        operands.append(mask_arr)
    in_specs += [
        pl.BlockSpec((9, N, N), lambda b: (0, 0, 0)),    # lepe shift matrices
        pl.BlockSpec((wb, N, C), lambda b: (b, 0, 0)),   # q (scale pre-folded)
        pl.BlockSpec((wb, N, C), lambda b: (b, 0, 0)),   # k
        pl.BlockSpec((wb, N, C), lambda b: (b, 0, 0)),   # v
        pl.BlockSpec((9, C), lambda b: (0, 0)),          # lepe taps (9, C)
        pl.BlockSpec((1, C), lambda b: (0, 0)),          # lepe bias
    ]
    operands += [shift_mats, q, k, v_flat, w9, b1]

    # TODO(synk): nn.Dropout(attn_drop) omitted — p=0.0 by default (identity).
    out = pl.pallas_call(
        kernel,
        out_shape=jax.ShapeDtypeStruct((B_, N, C), x.dtype),
        grid=(B_ // wb,),
        in_specs=in_specs,
        out_specs=pl.BlockSpec((wb, N, C), lambda b: (b, 0, 0)),
        compiler_params=pltpu.CompilerParams(
            dimension_semantics=("parallel",),
            vmem_limit_bytes=int(vmem_limit)),
    )(*operands)

    out = out.reshape(B_, Hw, Ww, C)
    return window_reverse_jax(out, window_size, H, W, index)


# ----------------------------------------------------------------------------
# Pure-JAX reference (mirrors the PyTorch forward; matmuls use the same
# bf16-in / f32-accumulate precision strategy as the kernel).
# ----------------------------------------------------------------------------
def reference_forward(x, mask, lepe_wgt, lepe_bias, *,
                      window_size, num_heads, index=0, qk_scale=None):
    qk, v = x[:2], x[2]
    B, H, W, C = v.shape
    hd = C // num_heads
    scale = qk_scale if qk_scale is not None else hd ** (-0.5)

    qk_win = window_partition_jax(qk, window_size, index)
    _, B_, Hw, Ww, _ = qk_win.shape
    N = Hw * Ww
    qk_h = qk_win.reshape(2, B_, Hw, Ww, num_heads, hd) \
                 .transpose(0, 1, 4, 2, 3, 5).reshape(2, B_, num_heads, N, hd)
    q, k = qk_h[0] * jnp.float32(scale), qk_h[1]

    v_win = window_partition_jax(v, window_size, index)
    lepe = lax.conv_general_dilated(
        v_win, lepe_wgt.reshape(3, 3, 1, C),
        window_strides=(1, 1), padding=((1, 1), (1, 1)),
        dimension_numbers=("NHWC", "HWIO", "NHWC"),
        feature_group_count=C,
        precision=lax.Precision.HIGHEST) + lepe_bias.reshape(1, 1, 1, C)

    v_h = v_win.reshape(B_, N, num_heads, hd).transpose(0, 2, 1, 3)
    lepe_h = lepe.reshape(B_, N, num_heads, hd).transpose(0, 2, 1, 3)

    attn = jnp.einsum("bhnd,bhmd->bhnm",
                      q.astype(jnp.bfloat16), k.astype(jnp.bfloat16),
                      preferred_element_type=jnp.float32)
    if mask is not None:
        nW = mask.shape[0]
        attn = attn.reshape(B_ // nW, nW, num_heads, N, N) \
            + mask[None, :, None].astype(jnp.float32)
        attn = attn.reshape(-1, num_heads, N, N)
    attn = jax.nn.softmax(attn, axis=-1)
    out = jnp.einsum("bhnm,bhmd->bhnd",
                     attn.astype(jnp.bfloat16), v_h.astype(jnp.bfloat16),
                     preferred_element_type=jnp.float32) + lepe_h
    out = out.transpose(0, 2, 1, 3).reshape(B_, Hw, Ww, C)
    return window_reverse_jax(out, window_size, H, W, index)


if __name__ == "__main__":
    # Small shapes consistent with the module's forward contract.
    B, H, W, C = 2, 8, 8, 32
    num_heads = 4
    window_size = (4, 4)
    index = 0
    N = window_size[0] * window_size[1]
    nW = (H // window_size[0]) * (W // window_size[1])

    key = jax.random.PRNGKey(0)
    k1, k2, k3, k4 = jax.random.split(key, 4)
    x = jax.random.normal(k1, (3, B, H, W, C), jnp.float32)
    # lepe depthwise conv params: weight stored as (3, 3, C) (== torch
    # (C,1,3,3) transposed to HWC), bias (C,).
    lepe_wgt = jax.random.normal(k2, (3, 3, C), jnp.float32) * 0.1
    lepe_bias = jax.random.normal(k3, (C,), jnp.float32) * 0.1
    # 0 / -100 additive attention mask (diagonal kept attendable).
    mask = jnp.where(jax.random.uniform(k4, (nW, N, N)) < 0.5, 0.0, -100.0)
    mask = jnp.where(jnp.eye(N)[None, :, :] > 0, 0.0, mask).astype(jnp.float32)

    out = window_attention_forward(
        x, mask, lepe_wgt, lepe_bias,
        window_size=window_size, num_heads=num_heads, index=index)
    out = jax.block_until_ready(out)

    ref = reference_forward(
        x, mask, lepe_wgt, lepe_bias,
        window_size=window_size, num_heads=num_heads, index=index)
    ref = jax.block_until_ready(ref)

    assert out.shape == (B, H, W, C), out.shape
    max_err = float(jnp.max(jnp.abs(out - ref)))
    assert jnp.allclose(out, ref, atol=2e-2, rtol=2e-2), max_err
    print("KERNEL_OK")
</pallas_src>

<mosaic_0001>
module attributes {stable_mosaic.version = 11 : i64} {
  func.func @_fused_attn_kernel(%arg0: i32, %arg1: memref<4x16x16xbf16, #tpu.memory_space<vmem>>, %arg2: memref<9x16x16xbf16, #tpu.memory_space<vmem>>, %arg3: memref<2x16x32xbf16, #tpu.memory_space<vmem>>, %arg4: memref<2x16x32xbf16, #tpu.memory_space<vmem>>, %arg5: memref<2x16x32xbf16, #tpu.memory_space<vmem>>, %arg6: memref<9x32xf32, #tpu.memory_space<vmem>>, %arg7: memref<1x32xf32, #tpu.memory_space<vmem>>, %arg8: memref<2x16x32xf32, #tpu.memory_space<vmem>>) attributes {dimension_semantics = [#tpu.dimension_semantics<parallel>], iteration_bounds = array<i64: 4>, scalar_prefetch = 0 : i64, scratch_operands = 0 : i64, tpu.core_type = #tpu.core_type<tc>, window_params = [{pipeline_mode = #tpu.pipeline_mode<synchronous>, transform_indices = @transform_0, window_bounds = array<i64: 4, 16, 16>}, {pipeline_mode = #tpu.pipeline_mode<synchronous>, transform_indices = @transform_1, window_bounds = array<i64: 9, 16, 16>}, {transform_indices = @transform_2, window_bounds = array<i64: 2, 16, 32>}, {transform_indices = @transform_3, window_bounds = array<i64: 2, 16, 32>}, {transform_indices = @transform_4, window_bounds = array<i64: 2, 16, 32>}, {pipeline_mode = #tpu.pipeline_mode<synchronous>, transform_indices = @transform_5, window_bounds = array<i64: 9, 32>}, {pipeline_mode = #tpu.pipeline_mode<synchronous>, transform_indices = @transform_6, window_bounds = array<i64: 1, 32>}, {transform_indices = @transform_7, window_bounds = array<i64: 2, 16, 32>}]} {
    %c0 = arith.constant 0 : index
    %c0_0 = arith.constant 0 : index
    %c0_1 = arith.constant 0 : index
    %0 = vector.load %arg5[%c0, %c0_0, %c0_1] : memref<2x16x32xbf16, #tpu.memory_space<vmem>>, vector<2x16x32xbf16>
    %cst = arith.constant 0.000000e+00 : f32
    %1 = vector.broadcast %cst : f32 to vector<2x16x32xf32>
    %c0_2 = arith.constant 0 : index
    %c0_3 = arith.constant 0 : index
    %c0_4 = arith.constant 0 : index
    %2 = vector.load %arg2[%c0_2, %c0_3, %c0_4] : memref<9x16x16xbf16, #tpu.memory_space<vmem>>, vector<1x16x16xbf16>
    %3 = vector.shape_cast %2 : vector<1x16x16xbf16> to vector<16x16xbf16>
    %4 = vector.shape_cast %3 : vector<16x16xbf16> to vector<1x16x16xbf16>
    %5 = vector.shape_cast %4 : vector<1x16x16xbf16> to vector<1x16x16xbf16>
    %6 = vector.broadcast %5 : vector<1x16x16xbf16> to vector<2x16x16xbf16>
    "tpu.trace_start"() <{level = 10 : i32, message = "wnm,wmc->wnc"}> : () -> ()
    %cst_5 = arith.constant dense<0.000000e+00> : vector<2x16x32xf32>
    %7 = tpu.matmul %6, %0, %cst_5 {dimension_numbers = #tpu.dot_dimension_numbers<[2], [1], [1], [2], [0, 0, 0, 1, 1, 2], [0], [0]>} : vector<2x16x16xbf16>, vector<2x16x32xbf16>, vector<2x16x32xf32> -> vector<2x16x32xf32>
    "tpu.trace_stop"() : () -> ()
    %c0_6 = arith.constant 0 : index
    %c0_7 = arith.constant 0 : index
    %8 = vector.load %arg6[%c0_6, %c0_7] : memref<9x32xf32, #tpu.memory_space<vmem>>, vector<1x32xf32>
    %9 = vector.shape_cast %8 : vector<1x32xf32> to vector<32xf32>
    %10 = vector.shape_cast %9 : vector<32xf32> to vector<1x1x32xf32>
    %11 = vector.broadcast %10 : vector<1x1x32xf32> to vector<2x16x32xf32>
    %12 = arith.mulf %7, %11 : vector<2x16x32xf32>
    %13 = arith.addf %1, %12 : vector<2x16x32xf32>
    %c1 = arith.constant 1 : index
    %c0_8 = arith.constant 0 : index
    %c0_9 = arith.constant 0 : index
    %14 = vector.load %arg2[%c1, %c0_8, %c0_9] : memref<9x16x16xbf16, #tpu.memory_space<vmem>>, vector<1x16x16xbf16>
    %15 = vector.shape_cast %14 : vector<1x16x16xbf16> to vector<16x16xbf16>
    %16 = vector.shape_cast %15 : vector<16x16xbf16> to vector<1x16x16xbf16>
    %17 = vector.shape_cast %16 : vector<1x16x16xbf16> to vector<1x16x16xbf16>
    %18 = vector.broadcast %17 : vector<1x16x16xbf16> to vector<2x16x16xbf16>
    "tpu.trace_start"() <{level = 10 : i32, message = "wnm,wmc->wnc"}> : () -> ()
    %cst_10 = arith.constant dense<0.000000e+00> : vector<2x16x32xf32>
    %19 = tpu.matmul %18, %0, %cst_10 {dimension_numbers = #tpu.dot_dimension_numbers<[2], [1], [1], [2], [0, 0, 0, 1, 1, 2], [0], [0]>} : vector<2x16x16xbf16>, vector<2x16x32xbf16>, vector<2x16x32xf32> -> vector<2x16x32xf32>
    "tpu.trace_stop"() : () -> ()
    %c1_11 = arith.constant 1 : index
    %c0_12 = arith.constant 0 : index
    %20 = vector.load %arg6[%c1_11, %c0_12] : memref<9x32xf32, #tpu.memory_space<vmem>>, vector<1x32xf32>
    %21 = vector.shape_cast %20 : vector<1x32xf32> to vector<32xf32>
    %22 = vector.shape_cast %21 : vector<32xf32> to vector<1x1x32xf32>
    %23 = vector.broadcast %22 : vector<1x1x32xf32> to vector<2x16x32xf32>
    %24 = arith.mulf %19, %23 : vector<2x16x32xf32>
    %25 = arith.addf %13, %24 : vector<2x16x32xf32>
    %c2 = arith.constant 2 : index
    %c0_13 = arith.constant 0 : index
    %c0_14 = arith.constant 0 : index
    %26 = vector.load %arg2[%c2, %c0_13, %c0_14] : memref<9x16x16xbf16, #tpu.memory_space<vmem>>, vector<1x16x16xbf16>
    %27 = vector.shape_cast %26 : vector<1x16x16xbf16> to vector<16x16xbf16>
    %28 = vector.shape_cast %27 : vector<16x16xbf16> to vector<1x16x16xbf16>
    %29 = vector.shape_cast %28 : vector<1x16x16xbf16> to vector<1x16x16xbf16>
    %30 = vector.broadcast %29 : vector<1x16x16xbf16> to vector<2x16x16xbf16>
    "tpu.trace_start"() <{level = 10 : i32, message = "wnm,wmc->wnc"}> : () -> ()
    %cst_15 = arith.constant dense<0.000000e+00> : vector<2x16x32xf32>
    %31 = tpu.matmul %30, %0, %cst_15 {dimension_numbers = #tpu.dot_dimension_numbers<[2], [1], [1], [2], [0, 0, 0, 1, 1, 2], [0], [0]>} : vector<2x16x16xbf16>, vector<2x16x32xbf16>, vector<2x16x32xf32> -> vector<2x16x32xf32>
    "tpu.trace_stop"() : () -> ()
    %c2_16 = arith.constant 2 : index
    %c0_17 = arith.constant 0 : index
    %32 = vector.load %arg6[%c2_16, %c0_17] : memref<9x32xf32, #tpu.memory_space<vmem>>, vector<1x32xf32>
    %33 = vector.shape_cast %32 : vector<1x32xf32> to vector<32xf32>
    %34 = vector.shape_cast %33 : vector<32xf32> to vector<1x1x32xf32>
    %35 = vector.broadcast %34 : vector<1x1x32xf32> to vector<2x16x32xf32>
    %36 = arith.mulf %31, %35 : vector<2x16x32xf32>
    %37 = arith.addf %25, %36 : vector<2x16x32xf32>
    %c3 = arith.constant 3 : index
    %c0_18 = arith.constant 0 : index
    %c0_19 = arith.constant 0 : index
    %38 = vector.load %arg2[%c3, %c0_18, %c0_19] : memref<9x16x16xbf16, #tpu.memory_space<vmem>>, vector<1x16x16xbf16>
    %39 = vector.shape_cast %38 : vector<1x16x16xbf16> to vector<16x16xbf16>
    %40 = vector.shape_cast %39 : vector<16x16xbf16> to vector<1x16x16xbf16>
    %41 = vector.shape_cast %40 : vector<1x16x16xbf16> to vector<1x16x16xbf16>
    %42 = vector.broadcast %41 : vector<1x16x16xbf16> to vector<2x16x16xbf16>
    "tpu.trace_start"() <{level = 10 : i32, message = "wnm,wmc->wnc"}> : () -> ()
    %cst_20 = arith.constant dense<0.000000e+00> : vector<2x16x32xf32>
    %43 = tpu.matmul %42, %0, %cst_20 {dimension_numbers = #tpu.dot_dimension_numbers<[2], [1], [1], [2], [0, 0, 0, 1, 1, 2], [0], [0]>} : vector<2x16x16xbf16>, vector<2x16x32xbf16>, vector<2x16x32xf32> -> vector<2x16x32xf32>
    "tpu.trace_stop"() : () -> ()
    %c3_21 = arith.constant 3 : index
    %c0_22 = arith.constant 0 : index
    %44 = vector.load %arg6[%c3_21, %c0_22] : memref<9x32xf32, #tpu.memory_space<vmem>>, vector<1x32xf32>
    %45 = vector.shape_cast %44 : vector<1x32xf32> to vector<32xf32>
    %46 = vector.shape_cast %45 : vector<32xf32> to vector<1x1x32xf32>
    %47 = vector.broadcast %46 : vector<1x1x32xf32> to vector<2x16x32xf32>
    %48 = arith.mulf %43, %47 : vector<2x16x32xf32>
    %49 = arith.addf %37, %48 : vector<2x16x32xf32>
    %c4 = arith.constant 4 : index
    %c0_23 = arith.constant 0 : index
    %c0_24 = arith.constant 0 : index
    %50 = vector.load %arg2[%c4, %c0_23, %c0_24] : memref<9x16x16xbf16, #tpu.memory_space<vmem>>, vector<1x16x16xbf16>
    %51 = vector.shape_cast %50 : vector<1x16x16xbf16> to vector<16x16xbf16>
    %52 = vector.shape_cast %51 : vector<16x16xbf16> to vector<1x16x16xbf16>
    %53 = vector.shape_cast %52 : vector<1x16x16xbf16> to vector<1x16x16xbf16>
    %54 = vector.broadcast %53 : vector<1x16x16xbf16> to vector<2x16x16xbf16>
    "tpu.trace_start"() <{level = 10 : i32, message = "wnm,wmc->wnc"}> : () -> ()
    %cst_25 = arith.constant dense<0.000000e+00> : vector<2x16x32xf32>
    %55 = tpu.matmul %54, %0, %cst_25 {dimension_numbers = #tpu.dot_dimension_numbers<[2], [1], [1], [2], [0, 0, 0, 1, 1, 2], [0], [0]>} : vector<2x16x16xbf16>, vector<2x16x32xbf16>, vector<2x16x32xf32> -> vector<2x16x32xf32>
    "tpu.trace_stop"() : () -> ()
    %c4_26 = arith.constant 4 : index
    %c0_27 = arith.constant 0 : index
    %56 = vector.load %arg6[%c4_26, %c0_27] : memref<9x32xf32, #tpu.memory_space<vmem>>, vector<1x32xf32>
    %57 = vector.shape_cast %56 : vector<1x32xf32> to vector<32xf32>
    %58 = vector.shape_cast %57 : vector<32xf32> to vector<1x1x32xf32>
    %59 = vector.broadcast %58 : vector<1x1x32xf32> to vector<2x16x32xf32>
    %60 = arith.mulf %55, %59 : vector<2x16x32xf32>
    %61 = arith.addf %49, %60 : vector<2x16x32xf32>
    %c5 = arith.constant 5 : index
    %c0_28 = arith.constant 0 : index
    %c0_29 = arith.constant 0 : index
    %62 = vector.load %arg2[%c5, %c0_28, %c0_29] : memref<9x16x16xbf16, #tpu.memory_space<vmem>>, vector<1x16x16xbf16>
    %63 = vector.shape_cast %62 : vector<1x16x16xbf16> to vector<16x16xbf16>
    %64 = vector.shape_cast %63 : vector<16x16xbf16> to vector<1x16x16xbf16>
    %65 = vector.shape_cast %64 : vector<1x16x16xbf16> to vector<1x16x16xbf16>
    %66 = vector.broadcast %65 : vector<1x16x16xbf16> to vector<2x16x16xbf16>
    "tpu.trace_start"() <{level = 10 : i32, message = "wnm,wmc->wnc"}> : () -> ()
    %cst_30 = arith.constant dense<0.000000e+00> : vector<2x16x32xf32>
    %67 = tpu.matmul %66, %0, %cst_30 {dimension_numbers = #tpu.dot_dimension_numbers<[2], [1], [1], [2], [0, 0, 0, 1, 1, 2], [0], [0]>} : vector<2x16x16xbf16>, vector<2x16x32xbf16>, vector<2x16x32xf32> -> vector<2x16x32xf32>
    "tpu.trace_stop"() : () -> ()
    %c5_31 = arith.constant 5 : index
    %c0_32 = arith.constant 0 : index
    %68 = vector.load %arg6[%c5_31, %c0_32] : memref<9x32xf32, #tpu.memory_space<vmem>>, vector<1x32xf32>
    %69 = vector.shape_cast %68 : vector<1x32xf32> to vector<32xf32>
    %70 = vector.shape_cast %69 : vector<32xf32> to vector<1x1x32xf32>
    %71 = vector.broadcast %70 : vector<1x1x32xf32> to vector<2x16x32xf32>
    %72 = arith.mulf %67, %71 : vector<2x16x32xf32>
    %73 = arith.addf %61, %72 : vector<2x16x32xf32>
    %c6 = arith.constant 6 : index
    %c0_33 = arith.constant 0 : index
    %c0_34 = arith.constant 0 : index
    %74 = vector.load %arg2[%c6, %c0_33, %c0_34] : memref<9x16x16xbf16, #tpu.memory_space<vmem>>, vector<1x16x16xbf16>
    %75 = vector.shape_cast %74 : vector<1x16x16xbf16> to vector<16x16xbf16>
    %76 = vector.shape_cast %75 : vector<16x16xbf16> to vector<1x16x16xbf16>
    %77 = vector.shape_cast %76 : vector<1x16x16xbf16> to vector<1x16x16xbf16>
    %78 = vector.broadcast %77 : vector<1x16x16xbf16> to vector<2x16x16xbf16>
    "tpu.trace_start"() <{level = 10 : i32, message = "wnm,wmc->wnc"}> : () -> ()
    %cst_35 = arith.constant dense<0.000000e+00> : vector<2x16x32xf32>
    %79 = tpu.matmul %78, %0, %cst_35 {dimension_numbers = #tpu.dot_dimension_numbers<[2], [1], [1], [2], [0, 0, 0, 1, 1, 2], [0], [0]>} : vector<2x16x16xbf16>, vector<2x16x32xbf16>, vector<2x16x32xf32> -> vector<2x16x32xf32>
    "tpu.trace_stop"() : () -> ()
    %c6_36 = arith.constant 6 : index
    %c0_37 = arith.constant 0 : index
    %80 = vector.load %arg6[%c6_36, %c0_37] : memref<9x32xf32, #tpu.memory_space<vmem>>, vector<1x32xf32>
    %81 = vector.shape_cast %80 : vector<1x32xf32> to vector<32xf32>
    %82 = vector.shape_cast %81 : vector<32xf32> to vector<1x1x32xf32>
    %83 = vector.broadcast %82 : vector<1x1x32xf32> to vector<2x16x32xf32>
    %84 = arith.mulf %79, %83 : vector<2x16x32xf32>
    %85 = arith.addf %73, %84 : vector<2x16x32xf32>
    %c7 = arith.constant 7 : index
    %c0_38 = arith.constant 0 : index
    %c0_39 = arith.constant 0 : index
    %86 = vector.load %arg2[%c7, %c0_38, %c0_39] : memref<9x16x16xbf16, #tpu.memory_space<vmem>>, vector<1x16x16xbf16>
    %87 = vector.shape_cast %86 : vector<1x16x16xbf16> to vector<16x16xbf16>
    %88 = vector.shape_cast %87 : vector<16x16xbf16> to vector<1x16x16xbf16>
    %89 = vector.shape_cast %88 : vector<1x16x16xbf16> to vector<1x16x16xbf16>
    %90 = vector.broadcast %89 : vector<1x16x16xbf16> to vector<2x16x16xbf16>
    "tpu.trace_start"() <{level = 10 : i32, message = "wnm,wmc->wnc"}> : () -> ()
    %cst_40 = arith.constant dense<0.000000e+00> : vector<2x16x32xf32>
    %91 = tpu.matmul %90, %0, %cst_40 {dimension_numbers = #tpu.dot_dimension_numbers<[2], [1], [1], [2], [0, 0, 0, 1, 1, 2], [0], [0]>} : vector<2x16x16xbf16>, vector<2x16x32xbf16>, vector<2x16x32xf32> -> vector<2x16x32xf32>
    "tpu.trace_stop"() : () -> ()
    %c7_41 = arith.constant 7 : index
    %c0_42 = arith.constant 0 : index
    %92 = vector.load %arg6[%c7_41, %c0_42] : memref<9x32xf32, #tpu.memory_space<vmem>>, vector<1x32xf32>
    %93 = vector.shape_cast %92 : vector<1x32xf32> to vector<32xf32>
    %94 = vector.shape_cast %93 : vector<32xf32> to vector<1x1x32xf32>
    %95 = vector.broadcast %94 : vector<1x1x32xf32> to vector<2x16x32xf32>
    %96 = arith.mulf %91, %95 : vector<2x16x32xf32>
    %97 = arith.addf %85, %96 : vector<2x16x32xf32>
    %c8 = arith.constant 8 : index
    %c0_43 = arith.constant 0 : index
    %c0_44 = arith.constant 0 : index
    %98 = vector.load %arg2[%c8, %c0_43, %c0_44] : memref<9x16x16xbf16, #tpu.memory_space<vmem>>, vector<1x16x16xbf16>
    %99 = vector.shape_cast %98 : vector<1x16x16xbf16> to vector<16x16xbf16>
    %100 = vector.shape_cast %99 : vector<16x16xbf16> to vector<1x16x16xbf16>
    %101 = vector.shape_cast %100 : vector<1x16x16xbf16> to vector<1x16x16xbf16>
    %102 = vector.broadcast %101 : vector<1x16x16xbf16> to vector<2x16x16xbf16>
    "tpu.trace_start"() <{level = 10 : i32, message = "wnm,wmc->wnc"}> : () -> ()
    %cst_45 = arith.constant dense<0.000000e+00> : vector<2x16x32xf32>
    %103 = tpu.matmul %102, %0, %cst_45 {dimension_numbers = #tpu.dot_dimension_numbers<[2], [1], [1], [2], [0, 0, 0, 1, 1, 2], [0], [0]>} : vector<2x16x16xbf16>, vector<2x16x32xbf16>, vector<2x16x32xf32> -> vector<2x16x32xf32>
    "tpu.trace_stop"() : () -> ()
    %c8_46 = arith.constant 8 : index
    %c0_47 = arith.constant 0 : index
    %104 = vector.load %arg6[%c8_46, %c0_47] : memref<9x32xf32, #tpu.memory_space<vmem>>, vector<1x32xf32>
    %105 = vector.shape_cast %104 : vector<1x32xf32> to vector<32xf32>
    %106 = vector.shape_cast %105 : vector<32xf32> to vector<1x1x32xf32>
    %107 = vector.broadcast %106 : vector<1x1x32xf32> to vector<2x16x32xf32>
    %108 = arith.mulf %103, %107 : vector<2x16x32xf32>
    %109 = arith.addf %97, %108 : vector<2x16x32xf32>
    %c0_48 = arith.constant 0 : index
    %c0_49 = arith.constant 0 : index
    %110 = vector.load %arg7[%c0_48, %c0_49] : memref<1x32xf32, #tpu.memory_space<vmem>>, vector<1x32xf32>
    %111 = vector.shape_cast %110 : vector<1x32xf32> to vector<32xf32>
    %112 = vector.shape_cast %111 : vector<32xf32> to vector<1x1x32xf32>
    %113 = vector.broadcast %112 : vector<1x1x32xf32> to vector<2x16x32xf32>
    %114 = arith.addf %109, %113 : vector<2x16x32xf32>
    %c2_i32 = arith.constant 2 : i32
    %c0_i32 = arith.constant 0 : i32
    %115 = arith.cmpi eq, %c2_i32, %c0_i32 : i32
    %c1_i32 = arith.constant 1 : i32
    %116 = arith.select %115, %c1_i32, %c2_i32 : i32
    %117 = arith.remsi %arg0, %116 : i32
    %c0_i32_50 = arith.constant 0 : i32
    %118 = arith.cmpi ne, %117, %c0_i32_50 : i32
    %c0_i32_51 = arith.constant 0 : i32
    %119 = arith.cmpi slt, %117, %c0_i32_51 : i32
    %c0_i32_52 = arith.constant 0 : i32
    %120 = arith.cmpi slt, %116, %c0_i32_52 : i32
    %121 = arith.xori %119, %120 : i1
    %122 = arith.andi %121, %118 : i1
    %123 = arith.addi %117, %116 : i32
    %124 = arith.select %122, %123, %117 : i32
    %c2_i32_53 = arith.constant 2 : i32
    %125 = arith.muli %124, %c2_i32_53 : i32
    %126 = tpu.assume_multiple %125, 2 : i32
    %127 = arith.index_cast %126 : i32 to index
    %c0_54 = arith.constant 0 : index
    %c0_55 = arith.constant 0 : index
    %128 = vector.load %arg1[%127, %c0_54, %c0_55] : memref<4x16x16xbf16, #tpu.memory_space<vmem>>, vector<2x16x16xbf16>
    %129 = arith.extf %128 : vector<2x16x16xbf16> to vector<2x16x16xf32>
    %c0_56 = arith.constant 0 : index
    %c0_57 = arith.constant 0 : index
    %c0_58 = arith.constant 0 : index
    %130 = vector.load %arg3[%c0_56, %c0_57, %c0_58] : memref<2x16x32xbf16, #tpu.memory_space<vmem>>, vector<2x16x32xbf16>
    %c0_59 = arith.constant 0 : index
    %c0_60 = arith.constant 0 : index
    %c0_61 = arith.constant 0 : index
    %131 = vector.load %arg4[%c0_59, %c0_60, %c0_61] : memref<2x16x32xbf16, #tpu.memory_space<vmem>>, vector<2x16x32xbf16>
    %132 = vector.extract_strided_slice %130 {offsets = [0, 0, 0], sizes = [2, 16, 8], strides = [1, 1, 1]} : vector<2x16x32xbf16> to vector<2x16x8xbf16>
    %133 = vector.extract_strided_slice %131 {offsets = [0, 0, 0], sizes = [2, 16, 8], strides = [1, 1, 1]} : vector<2x16x32xbf16> to vector<2x16x8xbf16>
    "tpu.trace_start"() <{level = 10 : i32, message = "wnd,wmd->wnm"}> : () -> ()
    %cst_62 = arith.constant dense<0.000000e+00> : vector<2x16x16xf32>
    %134 = tpu.matmul %132, %133, %cst_62 {dimension_numbers = #tpu.dot_dimension_numbers<[2], [2], [1], [1], [0, 0, 0, 1, 1, 1], [0], [0]>} : vector<2x16x8xbf16>, vector<2x16x8xbf16>, vector<2x16x16xf32> -> vector<2x16x16xf32>
    "tpu.trace_stop"() : () -> ()
    %135 = arith.addf %134, %129 : vector<2x16x16xf32>
    %cst_63 = arith.constant dense<0xFF800000> : vector<2x16xf32>
    %136 = vector.multi_reduction <maximumf>, %135, %cst_63 [2] : vector<2x16x16xf32> to vector<2x16xf32>
    %137 = vector.shape_cast %136 : vector<2x16xf32> to vector<2x16x1xf32>
    %138 = vector.broadcast %137 : vector<2x16x1xf32> to vector<2x16x16xf32>
    %139 = arith.subf %135, %138 : vector<2x16x16xf32>
    %140 = math.exp %139 : vector<2x16x16xf32>
    %cst_64 = arith.constant dense<0.000000e+00> : vector<2x16xf32>
    %141 = vector.multi_reduction <add>, %140, %cst_64 [2] : vector<2x16x16xf32> to vector<2x16xf32>
    %142 = vector.shape_cast %141 : vector<2x16xf32> to vector<2x16x1xf32>
    %143 = arith.truncf %140 : vector<2x16x16xf32> to vector<2x16x16xbf16>
    %144 = vector.extract_strided_slice %0 {offsets = [0, 0, 0], sizes = [2, 16, 8], strides = [1, 1, 1]} : vector<2x16x32xbf16> to vector<2x16x8xbf16>
    "tpu.trace_start"() <{level = 10 : i32, message = "wnm,wmd->wnd"}> : () -> ()
    %cst_65 = arith.constant dense<0.000000e+00> : vector<2x16x8xf32>
    %145 = tpu.matmul %143, %144, %cst_65 {dimension_numbers = #tpu.dot_dimension_numbers<[2], [1], [1], [2], [0, 0, 0, 1, 1, 2], [0], [0]>} : vector<2x16x16xbf16>, vector<2x16x8xbf16>, vector<2x16x8xf32> -> vector<2x16x8xf32>
    "tpu.trace_stop"() : () -> ()
    %146 = tpu.reciprocal %142 {approx = true} : vector<2x16x1xf32> -> vector<2x16x1xf32>
    %147 = vector.broadcast %146 : vector<2x16x1xf32> to vector<2x16x8xf32>
    %148 = arith.mulf %145, %147 : vector<2x16x8xf32>
    %149 = vector.extract_strided_slice %130 {offsets = [0, 0, 8], sizes = [2, 16, 8], strides = [1, 1, 1]} : vector<2x16x32xbf16> to vector<2x16x8xbf16>
    %150 = vector.extract_strided_slice %131 {offsets = [0, 0, 8], sizes = [2, 16, 8], strides = [1, 1, 1]} : vector<2x16x32xbf16> to vector<2x16x8xbf16>
    "tpu.trace_start"() <{level = 10 : i32, message = "wnd,wmd->wnm"}> : () -> ()
    %cst_66 = arith.constant dense<0.000000e+00> : vector<2x16x16xf32>
    %151 = tpu.matmul %149, %150, %cst_66 {dimension_numbers = #tpu.dot_dimension_numbers<[2], [2], [1], [1], [0, 0, 0, 1, 1, 1], [0], [0]>} : vector<2x16x8xbf16>, vector<2x16x8xbf16>, vector<2x16x16xf32> -> vector<2x16x16xf32>
    "tpu.trace_stop"() : () -> ()
    %152 = arith.addf %151, %129 : vector<2x16x16xf32>
    %cst_67 = arith.constant dense<0xFF800000> : vector<2x16xf32>
    %153 = vector.multi_reduction <maximumf>, %152, %cst_67 [2] : vector<2x16x16xf32> to vector<2x16xf32>
    %154 = vector.shape_cast %153 : vector<2x16xf32> to vector<2x16x1xf32>
    %155 = vector.broadcast %154 : vector<2x16x1xf32> to vector<2x16x16xf32>
    %156 = arith.subf %152, %155 : vector<2x16x16xf32>
    %157 = math.exp %156 : vector<2x16x16xf32>
    %cst_68 = arith.constant dense<0.000000e+00> : vector<2x16xf32>
    %158 = vector.multi_reduction <add>, %157, %cst_68 [2] : vector<2x16x16xf32> to vector<2x16xf32>
    %159 = vector.shape_cast %158 : vector<2x16xf32> to vector<2x16x1xf32>
    %160 = arith.truncf %157 : vector<2x16x16xf32> to vector<2x16x16xbf16>
    %161 = vector.extract_strided_slice %0 {offsets = [0, 0, 8], sizes = [2, 16, 8], strides = [1, 1, 1]} : vector<2x16x32xbf16> to vector<2x16x8xbf16>
    "tpu.trace_start"() <{level = 10 : i32, message = "wnm,wmd->wnd"}> : () -> ()
    %cst_69 = arith.constant dense<0.000000e+00> : vector<2x16x8xf32>
    %162 = tpu.matmul %160, %161, %cst_69 {dimension_numbers = #tpu.dot_dimension_numbers<[2], [1], [1], [2], [0, 0, 0, 1, 1, 2], [0], [0]>} : vector<2x16x16xbf16>, vector<2x16x8xbf16>, vector<2x16x8xf32> -> vector<2x16x8xf32>
    "tpu.trace_stop"() : () -> ()
    %163 = tpu.reciprocal %159 {approx = true} : vector<2x16x1xf32> -> vector<2x16x1xf32>
    %164 = vector.broadcast %163 : vector<2x16x1xf32> to vector<2x16x8xf32>
    %165 = arith.mulf %162, %164 : vector<2x16x8xf32>
    %166 = vector.extract_strided_slice %130 {offsets = [0, 0, 16], sizes = [2, 16, 8], strides = [1, 1, 1]} : vector<2x16x32xbf16> to vector<2x16x8xbf16>
    %167 = vector.extract_strided_slice %131 {offsets = [0, 0, 16], sizes = [2, 16, 8], strides = [1, 1, 1]} : vector<2x16x32xbf16> to vector<2x16x8xbf16>
    "tpu.trace_start"() <{level = 10 : i32, message = "wnd,wmd->wnm"}> : () -> ()
    %cst_70 = arith.constant dense<0.000000e+00> : vector<2x16x16xf32>
    %168 = tpu.matmul %166, %167, %cst_70 {dimension_numbers = #tpu.dot_dimension_numbers<[2], [2], [1], [1], [0, 0, 0, 1, 1, 1], [0], [0]>} : vector<2x16x8xbf16>, vector<2x16x8xbf16>, vector<2x16x16xf32> -> vector<2x16x16xf32>
    "tpu.trace_stop"() : () -> ()
    %169 = arith.addf %168, %129 : vector<2x16x16xf32>
    %cst_71 = arith.constant dense<0xFF800000> : vector<2x16xf32>
    %170 = vector.multi_reduction <maximumf>, %169, %cst_71 [2] : vector<2x16x16xf32> to vector<2x16xf32>
    %171 = vector.shape_cast %170 : vector<2x16xf32> to vector<2x16x1xf32>
    %172 = vector.broadcast %171 : vector<2x16x1xf32> to vector<2x16x16xf32>
    %173 = arith.subf %169, %172 : vector<2x16x16xf32>
    %174 = math.exp %173 : vector<2x16x16xf32>
    %cst_72 = arith.constant dense<0.000000e+00> : vector<2x16xf32>
    %175 = vector.multi_reduction <add>, %174, %cst_72 [2] : vector<2x16x16xf32> to vector<2x16xf32>
    %176 = vector.shape_cast %175 : vector<2x16xf32> to vector<2x16x1xf32>
    %177 = arith.truncf %174 : vector<2x16x16xf32> to vector<2x16x16xbf16>
    %178 = vector.extract_strided_slice %0 {offsets = [0, 0, 16], sizes = [2, 16, 8], strides = [1, 1, 1]} : vector<2x16x32xbf16> to vector<2x16x8xbf16>
    "tpu.trace_start"() <{level = 10 : i32, message = "wnm,wmd->wnd"}> : () -> ()
    %cst_73 = arith.constant dense<0.000000e+00> : vector<2x16x8xf32>
    %179 = tpu.matmul %177, %178, %cst_73 {dimension_numbers = #tpu.dot_dimension_numbers<[2], [1], [1], [2], [0, 0, 0, 1, 1, 2], [0], [0]>} : vector<2x16x16xbf16>, vector<2x16x8xbf16>, vector<2x16x8xf32> -> vector<2x16x8xf32>
    "tpu.trace_stop"() : () -> ()
    %180 = tpu.reciprocal %176 {approx = true} : vector<2x16x1xf32> -> vector<2x16x1xf32>
    %181 = vector.broadcast %180 : vector<2x16x1xf32> to vector<2x16x8xf32>
    %182 = arith.mulf %179, %181 : vector<2x16x8xf32>
    %183 = vector.extract_strided_slice %130 {offsets = [0, 0, 24], sizes = [2, 16, 8], strides = [1, 1, 1]} : vector<2x16x32xbf16> to vector<2x16x8xbf16>
    %184 = vector.extract_strided_slice %131 {offsets = [0, 0, 24], sizes = [2, 16, 8], strides = [1, 1, 1]} : vector<2x16x32xbf16> to vector<2x16x8xbf16>
    "tpu.trace_start"() <{level = 10 : i32, message = "wnd,wmd->wnm"}> : () -> ()
    %cst_74 = arith.constant dense<0.000000e+00> : vector<2x16x16xf32>
    %185 = tpu.matmul %183, %184, %cst_74 {dimension_numbers = #tpu.dot_dimension_numbers<[2], [2], [1], [1], [0, 0, 0, 1, 1, 1], [0], [0]>} : vector<2x16x8xbf16>, vector<2x16x8xbf16>, vector<2x16x16xf32> -> vector<2x16x16xf32>
    "tpu.trace_stop"() : () -> ()
    %186 = arith.addf %185, %129 : vector<2x16x16xf32>
    %cst_75 = arith.constant dense<0xFF800000> : vector<2x16xf32>
    %187 = vector.multi_reduction <maximumf>, %186, %cst_75 [2] : vector<2x16x16xf32> to vector<2x16xf32>
    %188 = vector.shape_cast %187 : vector<2x16xf32> to vector<2x16x1xf32>
    %189 = vector.broadcast %188 : vector<2x16x1xf32> to vector<2x16x16xf32>
    %190 = arith.subf %186, %189 : vector<2x16x16xf32>
    %191 = math.exp %190 : vector<2x16x16xf32>
    %cst_76 = arith.constant dense<0.000000e+00> : vector<2x16xf32>
    %192 = vector.multi_reduction <add>, %191, %cst_76 [2] : vector<2x16x16xf32> to vector<2x16xf32>
    %193 = vector.shape_cast %192 : vector<2x16xf32> to vector<2x16x1xf32>
    %194 = arith.truncf %191 : vector<2x16x16xf32> to vector<2x16x16xbf16>
    %195 = vector.extract_strided_slice %0 {offsets = [0, 0, 24], sizes = [2, 16, 8], strides = [1, 1, 1]} : vector<2x16x32xbf16> to vector<2x16x8xbf16>
    "tpu.trace_start"() <{level = 10 : i32, message = "wnm,wmd->wnd"}> : () -> ()
    %cst_77 = arith.constant dense<0.000000e+00> : vector<2x16x8xf32>
    %196 = tpu.matmul %194, %195, %cst_77 {dimension_numbers = #tpu.dot_dimension_numbers<[2], [1], [1], [2], [0, 0, 0, 1, 1, 2], [0], [0]>} : vector<2x16x16xbf16>, vector<2x16x8xbf16>, vector<2x16x8xf32> -> vector<2x16x8xf32>
    "tpu.trace_stop"() : () -> ()
    %197 = tpu.reciprocal %193 {approx = true} : vector<2x16x1xf32> -> vector<2x16x1xf32>
    %198 = vector.broadcast %197 : vector<2x16x1xf32> to vector<2x16x8xf32>
    %199 = arith.mulf %196, %198 : vector<2x16x8xf32>
    %200 = tpu.concatenate %148, %165, %182, %199 in 2 : vector<2x16x8xf32>, vector<2x16x8xf32>, vector<2x16x8xf32>, vector<2x16x8xf32> -> vector<2x16x32xf32>
    %201 = arith.addf %200, %114 : vector<2x16x32xf32>
    %c0_78 = arith.constant 0 : index
    %c0_79 = arith.constant 0 : index
    %c0_80 = arith.constant 0 : index
    %202 = vector.load %arg8[%c0_78, %c0_79, %c0_80] : memref<2x16x32xf32, #tpu.memory_space<vmem>>, vector<2x16x32xf32>
    tpu.vector_store %arg8[%c0_78, %c0_79, %c0_80], %201 {strides = array<i32>} : memref<2x16x32xf32, #tpu.memory_space<vmem>>, vector<2x16x32xf32>,
    return
  }
  func.func @transform_0(%arg0: i32) -> (i32, i32, i32) {
    %c0_i32 = arith.constant 0 : i32
    %c0_i32_0 = arith.constant 0 : i32
    %c0_i32_1 = arith.constant 0 : i32
    %c0_i32_2 = arith.constant 0 : i32
    return %c0_i32, %c0_i32_0, %c0_i32_1 : i32, i32, i32
  }
  func.func @transform_1(%arg0: i32) -> (i32, i32, i32) {
    %c0_i32 = arith.constant 0 : i32
    %c0_i32_0 = arith.constant 0 : i32
    %c0_i32_1 = arith.constant 0 : i32
    %c0_i32_2 = arith.constant 0 : i32
    return %c0_i32, %c0_i32_0, %c0_i32_1 : i32, i32, i32
  }
  func.func @transform_2(%arg0: i32) -> (i32, i32, i32) {
    %c0_i32 = arith.constant 0 : i32
    %c0_i32_0 = arith.constant 0 : i32
    %c0_i32_1 = arith.constant 0 : i32
    return %arg0, %c0_i32, %c0_i32_0 : i32, i32, i32
  }
  func.func @transform_3(%arg0: i32) -> (i32, i32, i32) {
    %c0_i32 = arith.constant 0 : i32
    %c0_i32_0 = arith.constant 0 : i32
    %c0_i32_1 = arith.constant 0 : i32
    return %arg0, %c0_i32, %c0_i32_0 : i32, i32, i32
  }
  func.func @transform_4(%arg0: i32) -> (i32, i32, i32) {
    %c0_i32 = arith.constant 0 : i32
    %c0_i32_0 = arith.constant 0 : i32
    %c0_i32_1 = arith.constant 0 : i32
    return %arg0, %c0_i32, %c0_i32_0 : i32, i32, i32
  }
  func.func @transform_5(%arg0: i32) -> (i32, i32) {
    %c0_i32 = arith.constant 0 : i32
    %c0_i32_0 = arith.constant 0 : i32
    %c0_i32_1 = arith.constant 0 : i32
    return %c0_i32, %c0_i32_0 : i32, i32
  }
  func.func @transform_6(%arg0: i32) -> (i32, i32) {
    %c0_i32 = arith.constant 0 : i32
    %c0_i32_0 = arith.constant 0 : i32
    %c0_i32_1 = arith.constant 0 : i32
    return %c0_i32, %c0_i32_0 : i32, i32
  }
  func.func @transform_7(%arg0: i32) -> (i32, i32, i32) {
    %c0_i32 = arith.constant 0 : i32
    %c0_i32_0 = arith.constant 0 : i32
    %c0_i32_1 = arith.constant 0 : i32
    return %arg0, %c0_i32, %c0_i32_0 : i32, i32, i32
  }
}

</mosaic_0001>

<bundles_post_ra>
// kernel: tpu_custom_call.1
= control target key start
LH: loop header
LB: loop body
LE: loop exit
PB: predicated region body
PF: predicated region fallthrough
CT: control target
= control target key end

     0   :  { %s4201_s0 = inlined_call_operand.hbm [shape: bf16[4,16,16], index: 0, kind: input, shape index: {}]   ;;  %s4202_s1 = inlined_call_operand.hbm [shape: bf16[9,16,16], index: 1, kind: input, shape index: {}]   ;;  %s4203_s2 = inlined_call_operand.hbm [shape: bf16[8,16,32], index: 2, kind: input, shape index: {}]   ;;  %s4204_s3 = inlined_call_operand.hbm [shape: bf16[8,16,32], index: 3, kind: input, shape index: {}]   ;;  %s4205_s4 = inlined_call_operand.hbm [shape: bf16[8,16,32], index: 4, kind: input, shape index: {}]   ;;  %s4206_s5 = inlined_call_operand.hbm [shape: f32[9,32], index: 5, kind: input, shape index: {}]   ;;  %s4207_s6 = inlined_call_operand.vmem [shape: f32[1,32], index: 6, kind: input, shape index: {}]   ;;  %s4208_s7 = inlined_call_operand.hbm [shape: f32[8,16,32], index: 7, kind: output, shape index: {}]  }
   0x1   :  { %4227 = sst [smem:[#allocation23_spill]] %s4201_s0 }
   0x2   :  { %4228 = sst [smem:[#allocation24_spill]] %s4203_s2 }
   0x3   :  { %12 = vsyncpa [#allocation3], 0 }
   0x4   :  { %13 = vsyncpa [#allocation6], 0 }
   0x5   :  { %14 = vsyncpa [#allocation4], 0 }
   0x6   :  { %16 = vsyncpa [#allocation4 + $0x1], 0  ;;  %s3505_s24 = smov 0   ;;  %s3507_s25 = smov 0  }
   0x7   :  { %s3509_s26 = smov 0   ;;  %s3511_s27 = smov 0  }
   0x8 LB: > { %4229 = sst [smem:[#allocation17_spill]] %s3431_s24  ;;  %s3526_s28 = sadd.s32 4294967295, %s3443_s27   ;;  %s3443_s27 = sphi %s3511_s27, %s4264_s27   ;;  %s3439_s26 = sphi %s3509_s26, %s4266_s26   ;;  %s3435_s25 = sphi %s3507_s25, %s4268_s25   ;;  %s3431_s24 = sphi %s3505_s24, %s4267_s24  }
   0x9   : > { %4230 = sst [smem:[#allocation18_spill]] %s3439_s26  ;;  %s2636_s29 = sadd.s32 4294967294, %s3443_s27  }
   0xa   : > { %4231 = sst [smem:[#allocation19_spill]] %s3443_s27  ;;  %s3530_s30 = sadd.s32 1, %s3443_s27  }
   0xb   : > { %4232 = sst [smem:[#allocation20_spill]] %s3530_s30  ;;  %s71_s8 = sadd.s32 1, %s3439_s26 }
   0xc   : > { %s68_s9 = ssub.s32 %s3443_s27, %s3530_s30  ;;  %p78_p0 = scmp.ne.s32.totalorder %s3439_s26, %s3435_s25 }
   0xd   : > { %p69_p1 = scmp.eq.s32.totalorder %s68_s9, 0  ;;  %p79_p2 = scmp.eq.s32.totalorder %s3443_s27, 0 }
   0xe   : > { %p84_p3 = scmp.ne.s32.totalorder %s3435_s25, %s3431_s24  ;;  %p4218_p4 = scmp.eq.s32.totalorder %s3526_s28, 0 }
   0xf   : > { %s3542_s10 = scalar_select %p69_p1, %s3439_s26, %s71_s8  }
  0x10   : > { %p3544_p5 = por %p79_p2, %p78_p0  ;;  %p3550_p6 = por %p4218_p4, %p84_p3 }
  0x11   : > { %4233 = sst [smem:[#allocation21_spill]] %s3542_s10  ;;  %p202_p7 = scmp.eq.s32.totalorder %s3526_s28, 3 }
  0x12   : > { %s4235_s12 = scalar_select %p3550_p6, 1, 0 }
  0x13   : > { %p208_p8 = scmp.eq.s32.totalorder %s2636_s29, 3  ;;  %p2637_p9 = scmp.ge.s32.totalorder %s3443_s27, 1 }
  0x14   : > { %p215_p10 = scmp.lt.s32.totalorder %s3443_s27, 5  ;;  %p3557_p11 = por %p202_p7, %p78_p0 }
  0x15   : > { %p3561_p12 = por %p208_p8, %p84_p3  ;;  %s3445_s16 = smov [#allocation2]  }
  0x16   : > { %s4236_s13 = scalar_select %p3557_p11, 1, 0 }
  0x17   : > { %s4237_s14 = scalar_select %p3561_p12, 1, 0 }
  0x18   : > { %p3565_p13 = pnand %p2637_p9, %p215_p10  ;;  %s227_s17 = sshll.u32 %s3445_s16, 4  ;;  %s228_s17 = int_to_ptr.vmem [resolvable:$true] %s227_s17 }
  0x19   : > { %4238 = sst [smem:[#allocation22_spill]] %s4237_s14  ;;  %p3071_p0 = scmp.lt.s32.totalorder %s3443_s27, 4 }
  0x1a   : > { %s4239_s15 = scalar_select %p3565_p13, 1, 0 }
  0x1b   : > { %p3044_p1 = pneg %p3565_p13  ;;  %s270_s19 = sand.u32 1, %s3443_s27  }
  0x1c   : > { %s3216_s20 = scalar_lea.vmem %s228_s17, 512  ;;  %p3224_p10 = scmp.lt.s32.totalorder %s228_s17, %s228_s17 }
  0x1d   : > { %p3573_p2 = pnand %p3044_p1, %p4218_p4  ;;  %p3217_p7 = scmp.ne.s32.totalorder %s228_s17, %s3216_s20 }
  0x1e   : > { %p3225_p12 = scmp.lt.s32.totalorder %s3216_s20, %s3216_s20 }
  0x1f   : > { %s4240_s18 = scalar_select %p3573_p2, 1, 0 }
  0x20   : > { %p4219_p3 = pneg %p3573_p2  ;;  %p3226_p11 = por %p3225_p12, %p3224_p10 }
  0x22   : > { %p3219_p8 = pnand %p3217_p7, %p4219_p3 }
  0x24   : > { %p3220_p9 = pneg %p3219_p8 }
  0x26   : > { %p3227_p6 = pnand %p3226_p11, %p3220_p9 }
  0x28   : > { %3230 = shalt.err (!%p3227_p6)
}
  0x29   : > { %s4214_s21 = smov 64   ;;  %s4216_s22 = smov 4  }
  0x2a   : > { %s4241_s0 = sld [smem:[#allocation23_spill]]  ;;  %p3596_p12 = pnand %p3071_p0, %p3544_p5 }
  0x2b   : > { %s272_s9 = sand.u32 1, %s3439_s26   ;;  %s3604_s20 = sshll.u32 %s3443_s27, 8 }
  0x2c   : > { %s3601_s16 = sshll.u32 %s272_s9, 4  ;;  %s4243_s2 = sld [smem:[#allocation24_spill]] }
  0x2d   : > { %s274_s11 = scalar_lea.vmem [#allocation7], %s3601_s16  ;;  %s3615_s23 = scalar_lea.sflag [#allocation3], %s270_s19 }
  0x2e   : > { %p3621_p6 = pneg %p3596_p12 }
  0x30   : > { %3047 = dma.hbm_to_vmem [thread:$0]  (!%p3573_p2), %s4241_s0, 512, %s228_s17, [#allocation3], %s4214_s21, %s4214_s21, %s4216_s22  }
  0x31   : > { %s282_s17 = sshll.u32 %s274_s11, 4  ;;  %s3613_s17 = int_to_ptr.vmem [resolvable:$true] %s282_s17 }
  0x32   : > { %s3610_s14 = scalar_lea.hbm %s4243_s2, %s3604_s20  ;;  %s3236_s21 = scalar_lea.hbm %s4243_s2, 1024 }
  0x33   : > { %s3231_s29 = scalar_lea.hbm %s3610_s14, 256  ;;  %p3237_p0 = scmp.lt.s32.totalorder %s3610_s14, %s4243_s2 }
  0x34   : > { %p3232_p5 = scmp.ne.s32.totalorder %s3610_s14, %s3231_s29  ;;  %p3238_p7 = scmp.lt.s32.totalorder %s3236_s21, %s3231_s29 }
  0x36   : > { %p3234_p11 = pnand %p3621_p6, %p3232_p5  ;;  %p3239_p8 = por %p3238_p7, %p3237_p0 }
  0x38   : > { %p3235_p1 = pneg %p3234_p11 }
  0x3a   : > { %p3240_p9 = pnand %p3239_p8, %p3235_p1 }
  0x3c   : > { %3243 = shalt.err (!%p3240_p9)
}
  0x3d   : > { %s3244_s19 = scalar_lea.vmem %s3613_s17, 256  ;;  %s3448_s0 = smov [#allocation7]  }
  0x3e   : > { %p3245_p10 = scmp.ne.s32.totalorder %s3613_s17, %s3244_s19  ;;  %s3249_s30 = sshll.u32 %s3448_s0, 4  ;;  %s3250_s30 = int_to_ptr.vmem [resolvable:$false] %s3249_s30 }
  0x3f   : > { %s3251_s10 = scalar_lea.vmem %s3250_s30, 512  ;;  %p3252_p4 = scmp.lt.s32.totalorder %s3613_s17, %s3250_s30 }
  0x40   : > { %p3247_p5 = pnand %p3245_p10, %p3621_p6  ;;  %p3253_p3 = scmp.lt.s32.totalorder %s3251_s10, %s3244_s19 }
  0x42   : > { %p3248_p11 = pneg %p3247_p5  ;;  %p3254_p13 = por %p3253_p3, %p3252_p4 }
  0x44   : > { %p3255_p2 = pnand %p3254_p13, %p3248_p11 }
  0x46   : > { %3258 = shalt.err (!%p3255_p2)
}
  0x47   : > { %s4245_s21 = smov 4   ;;  %s4246_s22 = smov 64  }
  0x48   : > { %3057 = dma.hbm_to_vmem [thread:$0]  (!%p3596_p12), %s3610_s14, 256, %s3613_s17, %s3615_s23, %s4246_s22, %s4246_s22, %s4245_s21  }
  0x49   : > { %s3449_s29 = smov [#allocation5]   ;;  %s3651_s19 = scalar_lea.hbm %s4204_s3, %s3604_s20 }
  0x4a   : > { %s240_s0 = sshll.u32 %s3449_s29, 4  ;;  %p4247_p13 = scmp.ne.s32.totalorder %s4240_s18, 0  ;;  %s241_s0 = int_to_ptr.vmem [resolvable:$true] %s240_s0 }
  0x4b   : > { %s3270_s10 = scalar_lea.vmem %s241_s0, 1152  ;;  %p3278_p0 = scmp.lt.s32.totalorder %s241_s0, %s241_s0 }
  0x4c   : > { %p3271_p4 = scmp.ne.s32.totalorder %s241_s0, %s3270_s10  ;;  %p4248_p2 = pneg %p4247_p13 }
  0x4d   : > { %p3279_p7 = scmp.lt.s32.totalorder %s3270_s10, %s3270_s10 }
  0x4e   : > { %p3273_p3 = pnand %p3271_p4, %p4248_p2 }
  0x4f   : > { %p3280_p8 = por %p3279_p7, %p3278_p0 }
  0x50   : > { %p3274_p1 = pneg %p3273_p3 }
  0x52   : > { %p3281_p9 = pnand %p3280_p8, %p3274_p1 }
  0x54   : > { %3284 = shalt.err (!%p3281_p9)
}
  0x55   : > { %3050 = dma.hbm_to_vmem [thread:$0]  (!%p4247_p13), %s4202_s1, 1152, %s241_s0, [#allocation6], %s4246_s22, %s4246_s22, %s4245_s21  }
  0x56   : > { %s296_s29 = scalar_lea.vmem [#allocation8], %s3601_s16  ;;  %s3450_s30 = smov [#allocation10]  }
  0x57   : > { %s304_s11 = sshll.u32 %s296_s29, 4  ;;  %s3667_s10 = sshll.u32 %s3450_s30, 4  ;;  %s3665_s11 = int_to_ptr.vmem [resolvable:$true] %s304_s11  ;;  %s254_s10 = int_to_ptr.vmem [resolvable:$true] %s3667_s10 }
  0x58   : > { %s3285_s2 = scalar_lea.hbm %s3651_s19, 256  ;;  %s3290_s17 = scalar_lea.hbm %s4204_s3, 1024 }
  0x59   : > { %p3286_p10 = scmp.ne.s32.totalorder %s3651_s19, %s3285_s2  ;;  %p3291_p4 = scmp.lt.s32.totalorder %s3651_s19, %s4204_s3 }
  0x5a   : > { %p3292_p2 = scmp.lt.s32.totalorder %s3290_s17, %s3285_s2 }
  0x5b   : > { %p3288_p5 = pnand %p3286_p10, %p3621_p6 }
  0x5c   : > { %p3293_p3 = por %p3292_p2, %p3291_p4 }
  0x5d   : > { %p3289_p11 = pneg %p3288_p5 }
  0x5f   : > { %p3294_p1 = pnand %p3293_p3, %p3289_p11 }
  0x61   : > { %3297 = shalt.err (!%p3294_p1)
}
  0x62   : > { %s3298_s0 = scalar_lea.vmem %s3665_s11, 256  ;;  %s3451_s29 = smov [#allocation8]  }
  0x63   : > { %p3299_p0 = scmp.ne.s32.totalorder %s3665_s11, %s3298_s0  ;;  %s3303_s26 = sshll.u32 %s3451_s29, 4  ;;  %s3304_s26 = int_to_ptr.vmem [resolvable:$false] %s3303_s26 }
  0x64   : > { %s3305_s30 = scalar_lea.vmem %s3304_s26, 512  ;;  %p3306_p9 = scmp.lt.s32.totalorder %s3665_s11, %s3304_s26 }
  0x65   : > { %p3301_p7 = pnand %p3299_p0, %p3621_p6  ;;  %p3307_p10 = scmp.lt.s32.totalorder %s3305_s30, %s3298_s0 }
  0x67   : > { %p3302_p8 = pneg %p3301_p7  ;;  %p3308_p5 = por %p3307_p10, %p3306_p9 }
  0x69   : > { %p3309_p13 = pnand %p3308_p5, %p3302_p8 }
  0x6b   : > { %3312 = shalt.err (!%p3309_p13)
}
  0x6c   : > { %3060 = dma.hbm_to_vmem [thread:$0]  (!%p3596_p12), %s3651_s19, 256, %s3665_s11, %s3615_s23, %s4246_s22, %s4246_s22, %s4245_s21  }
  0x6d   : > { %s3324_s2 = scalar_lea.vmem %s254_s10, 256  ;;  %p4249_p4 = scmp.ne.s32.totalorder %s4240_s18, 0 }
  0x6e   : > { %p3325_p11 = scmp.ne.s32.totalorder %s254_s10, %s3324_s2  ;;  %p3332_p0 = scmp.lt.s32.totalorder %s254_s10, %s254_s10 }
  0x6f   : > { %p4250_p2 = pneg %p4249_p4  ;;  %p3333_p13 = scmp.lt.s32.totalorder %s3324_s2, %s3324_s2 }
  0x71   : > { %p3327_p3 = pnand %p3325_p11, %p4250_p2  ;;  %p3334_p7 = por %p3333_p13, %p3332_p0 }
  0x73   : > { %p3328_p1 = pneg %p3327_p3 }
  0x75   : > { %p3335_p8 = pnand %p3334_p7, %p3328_p1 }
  0x77   : > { %3338 = shalt.err (!%p3335_p8)
}
  0x78   : > { %s3452_s24 = smov 128   ;;  %s3453_s27 = smov 8  }
  0x79   : > { %3053 = dma.hbm_to_vmem [thread:$0]  (!%p4249_p4), %s4206_s5, 256, %s254_s10, [#allocation6], %s3452_s24, %s3452_s24, %s3453_s27  }
  0x7a   : > { %s3706_s0 = scalar_lea.hbm %s4205_s4, %s3604_s20  ;;  %s318_s29 = scalar_lea.vmem [#allocation9], %s3601_s16 }
  0x7b   : > { %s326_s26 = sshll.u32 %s318_s29, 4  ;;  %s3339_s30 = scalar_lea.hbm %s3706_s0, 256  ;;  %s327_s26 = int_to_ptr.vmem [resolvable:$true] %s326_s26 }
  0x7c   : > { %p3340_p9 = scmp.ne.s32.totalorder %s3706_s0, %s3339_s30  ;;  %s3344_s10 = scalar_lea.hbm %s4205_s4, 1024 }
  0x7d   : > { %p3345_p11 = scmp.lt.s32.totalorder %s3706_s0, %s4205_s4  ;;  %p3346_p4 = scmp.lt.s32.totalorder %s3344_s10, %s3339_s30 }
  0x7e   : > { %p3342_p10 = pnand %p3340_p9, %p3621_p6 }
  0x7f   : > { %p3347_p2 = por %p3346_p4, %p3345_p11 }
  0x80   : > { %p3343_p5 = pneg %p3342_p10 }
  0x82   : > { %p3348_p3 = pnand %p3347_p2, %p3343_p5 }
  0x84   : > { %3351 = shalt.err (!%p3348_p3)
}
  0x85   : > { %s3352_s16 = scalar_lea.vmem %s327_s26, 256  ;;  %s3454_s20 = smov [#allocation9]  }
  0x86   : > { %p3353_p1 = scmp.ne.s32.totalorder %s327_s26, %s3352_s16  ;;  %s3357_s19 = sshll.u32 %s3454_s20, 4  ;;  %s3358_s19 = int_to_ptr.vmem [resolvable:$false] %s3357_s19 }
  0x87   : > { %s3359_s11 = scalar_lea.vmem %s3358_s19, 512  ;;  %p3360_p7 = scmp.lt.s32.totalorder %s327_s26, %s3358_s19 }
  0x88   : > { %p3355_p0 = pnand %p3353_p1, %p3621_p6  ;;  %p3361_p8 = scmp.lt.s32.totalorder %s3359_s11, %s3352_s16 }
  0x8a   : > { %p3356_p13 = pneg %p3355_p0  ;;  %p3362_p9 = por %p3361_p8, %p3360_p7 }
  0x8c   : > { %p3363_p10 = pnand %p3362_p9, %p3356_p13 }
  0x8e   : > { %3366 = shalt.err (!%p3363_p10)
}
  0x8f   : > { %3063 = dma.hbm_to_vmem [thread:$0]  (!%p3596_p12), %s3706_s0, 256, %s327_s26, %s3615_s23, %s4246_s22, %s4246_s22, %s4245_s21  }
  0x90   : > { %p4251_p6 = scmp.ne.s32.totalorder %s4239_s15, 0 }
  0x91   : > { %p4252_p5 = scmp.eq.s32.totalorder (!%p4251_p6), %s3526_s28, 0 }
  0x92   : > { %338 = sbr.rel (%p4251_p6) target bundleno = 2078 (0x81e), region = 48 }
  0x97   : > { %3410 = dma.done.wait (%p4252_p5), [#allocation3], 512   ;;  %p4253_p11 = pmov %p4252_p5 }
  0x98   : > { %p4254_p4 = pmov %p4252_p5 }
  0x99   : > { %3412 = vsyncadd (%p4253_p11), [#allocation3], 4294966784 }
  0x9a   : > { %3414 = dma.done.wait (%p4254_p4), [#allocation6], 1152   ;;  %p4255_p2 = pmov %p4254_p4 }
  0x9b   : > { %s348_s8 = sand.u32 1, %s3526_s28   ;;  %s3741_s23 = sand.u32 1, %s3435_s25  }
  0x9c   : > { %3416 = vsyncadd (%p4255_p2), [#allocation6], 4294966144  ;;  %s3744_s15 = sshll.u32 %s3741_s23, 4  ;;  %s349_s9 = scalar_lea.sflag [#allocation3], %s348_s8 }
  0x9d   : > { %s352_s21 = scalar_lea.vmem [#allocation7], %s3744_s15  ;;  %p4256_p12 = scmp.ne.s32.totalorder %s4235_s12, 0 }
  0x9f   : > { %3418 = dma.done.wait (%p4256_p12), %s349_s9, 768  }
  0xa0   : > { %3420 = vsyncadd (%p4256_p12), %s349_s9, 4294966528  ;;  %s361_s22 = scalar_lea.vmem [#allocation8], %s3744_s15  ;;  %s3753_s14 = scalar_lea.vmem [#allocation9], %s3744_s15 }
  0xa1   : > { %p4257_p3 = pmov %p4255_p2 }
  0xa2   : > { %p4258_p1 = pmov %p4255_p2 }
  0xa3   : > { %3422 = dma.done.wait (%p4257_p3), [#allocation6], 256  }
  0xa4   : > { %3424 = vsyncadd (%p4258_p1), [#allocation6], 4294967040  ;;  %v3455_v0 = vmov 0.0   ;;  %vm3456_vm0 = vmmov 0   ;;  %v3766_v1 = vld [vmem:[%s3753_s14] sm:$0xff]   ;;  %v3769_v2 = vld [vmem:[%s3753_s14 + $0x8] sm:$0xff]  }
  0xa5   : > { %2820 = vmatprep.subr.bf16.mxu0 %v3455_v0  ;;  %2826 = vmatprep.subr.bf16.mxu1 %v3455_v0  ;;  %v3126_v3 = vld [vmem:[#allocation5] sm:$0xff]   ;;  %vm437_vm1 = vcmask 130048   ;;  %v3127_v4 = vld [vmem:[#allocation5 + $0x8] sm:$0xff]   ;;  %v3128_v5 = vld [vmem:[#allocation5 + $0x10] sm:$0xff]   ;;  %vm1443_vm2 = vcmask 64512   ;;  %s1402_s12 = ssub.s32 0, %s3526_s28 }
  0xa6   : > { %2822 = vmatprep.mubr.msk.bf16.mxu0 %vm3456_vm0, %v3455_v0  ;;  %2828 = vmatprep.mubr.msk.bf16.mxu1 %vm3456_vm0, %v3455_v0  ;;  %v3129_v6 = vld [vmem:[#allocation5 + $0x18] sm:$0xff]   ;;  %v3130_v7 = vld [vmem:[#allocation5 + $0x20] sm:$0xff]   ;;  %v3131_v8 = vld [vmem:[#allocation5 + $0x28] sm:$0xff]   ;;  %s2701_s17 = smin.u32 %s3526_s28, %s1402_s12  ;;  %p1401_p0 = scmp.lt.s32.totalorder %s3526_s28, 0  ;;  %vm2464_vm3 = vcmask 195584   ;;  %vm2473_vm4 = vcmask 261120  }
  0xa7   : > { %2821 = vmatpush3.bf16.msra.mxu0 %v3766_v1  ;;  %2827 = vmatpush3.bf16.msra.mxu1 %v3769_v2  ;;  %v3132_v9 = vld [vmem:[#allocation5 + $0x30] sm:$0xff]   ;;  %v3133_v10 = vld [vmem:[#allocation5 + $0x38] sm:$0xff]   ;;  %v3134_v13 = vld [vmem:[#allocation5 + $0x40] sm:$0xff]   ;;  %s1404_s0 = sand.u32 1, %s2701_s17   ;;  %s3457_s2 = smov 120  }
  0xa8   : > { %2832 = vmatprep.subr.bf16.mxu0 %v3455_v0  ;;  %2838 = vmatprep.subr.bf16.mxu1 %v3455_v0  ;;  %v3853_v11 = vld [vmem:[%s361_s22] sm:$0xff]   ;;  %v3860_v12 = vld [vmem:[%s361_s22 + $0x8] sm:$0xff]   ;;  %s1405_s29 = ssub.s32 0, %s1404_s0  ;;  %s3458_s10 = smov 112  }
  0xa9   : > { %v1448_v14 = vsel %vm1443_vm2, %v3853_v11, 0  ;;  %v1505_v15 = vsel %vm1443_vm2, %v3860_v12, 0  ;;  %v3876_v16 = vld [vmem:[%s352_s21] sm:$0xff]   ;;  %v3881_v17 = vld [vmem:[%s352_s21 + $0x8] sm:$0xff]   ;;  %s4270_s29 = smov (!%p1401_p0, %s1405_s29), %s1404_s0  ;;  %s3459_s24 = smov 104  }
  0xaa   : > { %2823 = vmatmul.mubr.msk.bf16.vlgmr.msra.gmra.mxu0 %vm437_vm1, %v3126_v3  ;;  %2829 = vmatmul.mubr.msk.bf16.vlgmr.msra.gmra.mxu1 %vm437_vm1, %v3126_v3  ;;  %v2667_v24 = vld [vmem:[#allocation10] ss:$0 sm:$0xff]  ;;  %v2671_v28 = vld [vmem:[#allocation10 + $0x1] ss:$0 sm:$0xff]  ;;  %v2675_v47 = vld [vmem:[#allocation10 + $0x2] ss:$0 sm:$0xff] }
  0xab   : > { %2833 = vmatpush3.bf16.msra.mxu0 %v3766_v1  ;;  %2839 = vmatpush3.bf16.msra.mxu1 %v3769_v2  ;;  %v2679_v3 = vld [vmem:[#allocation10 + $0x3] ss:$0 sm:$0xff]  ;;  %p2703_p13 = scmp.lt.s32.totalorder %s4270_s29, 0  ;;  %s1411_s26 = sadd.s32 2, %s4270_s29 }
  0xac   : > { %2834 = vmatprep.mubr.msk.bf16.mxu0 %vm3456_vm0, %v3455_v0  ;;  %2840 = vmatprep.mubr.msk.bf16.mxu1 %vm3456_vm0, %v3455_v0  ;;  %s3460_s27 = smov 8   ;;  %s3461_s16 = smov 16  }
  0xad   : > { %2850 = vmatprep.subr.bf16.mxu1 %v3455_v0  ;;  %2844 = vmatprep.subr.bf16.mxu0 %v3455_v0  ;;  %s4272_s26 = smov (!%p2703_p13, %s1411_s26), %s4270_s29  ;;  %s3462_s20 = smov 24  }
  0xae   : > { %s2740_s30 = sshll.u32 %s4272_s26, 4  ;;  %s2661_s8 = sshll.u32 %s3741_s23, 5 }
  0xaf   : > { %s1416_s18 = scalar_lea.vmem [#allocation2], %s2740_s30  ;;  %s414_s15 = scalar_lea.vmem [#allocation11], %s2661_s8 }
  0xb0   : > { %s2493_s9 = sshll.u32 %s414_s15, 4  ;;  %s2742_s21 = sshll.u32 %s3526_s28, 9  ;;  %s4151_s9 = int_to_ptr.vmem [resolvable:$true] %s2493_s9 }
  0xb1   : > { %s4157_s12 = scalar_lea.hbm %s4208_s7, %s2742_s21  ;;  %s2479_s28 = scalar_lea.sflag [#allocation4], %s3741_s23 }
  0xb2   : > { %2835 = vmatmul.mubr.msk.bf16.vlgmr.msra.gmra.mxu0 %vm437_vm1, %v3127_v4  ;;  %2841 = vmatmul.mubr.msk.bf16.vlgmr.msra.gmra.mxu1 %vm437_vm1, %v3127_v4  ;;  %s3367_s17 = scalar_lea.vmem %s4151_s9, 512  ;;  %p4259_p8 = scmp.ne.s32.totalorder %s4236_s13, 0 }
  0xb3   : > { %2845 = vmatpush3.bf16.msra.mxu0 %v3766_v1  ;;  %2851 = vmatpush3.bf16.msra.mxu1 %v3769_v2  ;;  %p3368_p7 = scmp.ne.s32.totalorder %s4151_s9, %s3367_s17  ;;  %s3463_s0 = smov [#allocation11]  }
  0xb4   : > { %2846 = vmatprep.mubr.msk.bf16.mxu0 %vm3456_vm0, %v3455_v0  ;;  %2852 = vmatprep.mubr.msk.bf16.mxu1 %vm3456_vm0, %v3455_v0  ;;  %s3371_s29 = sshll.u32 %s3463_s0, 4  ;;  %s3372_s29 = int_to_ptr.vmem [resolvable:$false] %s3371_s29 }
  0xb5   : > { %2862 = vmatprep.subr.bf16.mxu1 %v3455_v0  ;;  %2856 = vmatprep.subr.bf16.mxu0 %v3455_v0  ;;  %p3369_p9 = pnand %p3368_p7, %p4259_p8  ;;  %s3373_s26 = scalar_lea.vmem %s3372_s29, 1024 }
  0xb6   : > { %p3374_p6 = scmp.lt.s32.totalorder %s4151_s9, %s3372_s29  ;;  %p3375_p5 = scmp.lt.s32.totalorder %s3373_s26, %s3367_s17 }
  0xb7   : > { %p3370_p10 = pneg %p3369_p9 }
  0xb8   : > { %p3376_p11 = por %p3375_p5, %p3374_p6 }
  0xba   : > { %2847 = vmatmul.mubr.msk.bf16.vlgmr.msra.gmra.mxu0 %vm437_vm1, %v3128_v5  ;;  %2853 = vmatmul.mubr.msk.bf16.vlgmr.msra.gmra.mxu1 %vm437_vm1, %v3128_v5  ;;  %p3377_p4 = pnand %p3376_p11, %p3370_p10 }
  0xbb   : > { %2857 = vmatpush3.bf16.msra.mxu0 %v3766_v1  ;;  %2863 = vmatpush3.bf16.msra.mxu1 %v3769_v2 }
  0xbc   : > { %2858 = vmatprep.mubr.msk.bf16.mxu0 %vm3456_vm0, %v3455_v0  ;;  %2864 = vmatprep.mubr.msk.bf16.mxu1 %vm3456_vm0, %v3455_v0 }
  0xbd   : > { %2874 = vmatprep.subr.bf16.mxu1 %v3455_v0  ;;  %2868 = vmatprep.subr.bf16.mxu0 %v3455_v0 }
  0xc2   : > { %2859 = vmatmul.mubr.msk.bf16.vlgmr.msra.gmra.mxu0 %vm437_vm1, %v3129_v6  ;;  %2865 = vmatmul.mubr.msk.bf16.vlgmr.msra.gmra.mxu1 %vm437_vm1, %v3129_v6 }
  0xc3   : > { %2869 = vmatpush3.bf16.msra.mxu0 %v3766_v1  ;;  %2875 = vmatpush3.bf16.msra.mxu1 %v3769_v2 }
  0xc4   : > { %2870 = vmatprep.mubr.msk.bf16.mxu0 %vm3456_vm0, %v3455_v0  ;;  %2876 = vmatprep.mubr.msk.bf16.mxu1 %vm3456_vm0, %v3455_v0 }
  0xc5   : > { %2886 = vmatprep.subr.bf16.mxu1 %v3455_v0  ;;  %2880 = vmatprep.subr.bf16.mxu0 %v3455_v0 }
  0xca   : > { %2871 = vmatmul.mubr.msk.bf16.vlgmr.msra.gmra.mxu0 %vm437_vm1, %v3130_v7  ;;  %2877 = vmatmul.mubr.msk.bf16.vlgmr.msra.gmra.mxu1 %vm437_vm1, %v3130_v7 }
  0xcb   : > { %2881 = vmatpush3.bf16.msra.mxu0 %v3766_v1  ;;  %2887 = vmatpush3.bf16.msra.mxu1 %v3769_v2 }
  0xcc   : > { %2882 = vmatprep.mubr.msk.bf16.mxu0 %vm3456_vm0, %v3455_v0  ;;  %2888 = vmatprep.mubr.msk.bf16.mxu1 %vm3456_vm0, %v3455_v0 }
  0xcd   : > { %2898 = vmatprep.subr.bf16.mxu1 %v3455_v0  ;;  %2892 = vmatprep.subr.bf16.mxu0 %v3455_v0 }
  0xd2   : > { %2883 = vmatmul.mubr.msk.bf16.vlgmr.msra.gmra.mxu0 %vm437_vm1, %v3131_v8  ;;  %2889 = vmatmul.mubr.msk.bf16.vlgmr.msra.gmra.mxu1 %vm437_vm1, %v3131_v8 }
  0xd3   : > { %2893 = vmatpush3.bf16.msra.mxu0 %v3766_v1  ;;  %2899 = vmatpush3.bf16.msra.mxu1 %v3769_v2 }
  0xd4   : > { %2894 = vmatprep.mubr.msk.bf16.mxu0 %vm3456_vm0, %v3455_v0  ;;  %2900 = vmatprep.mubr.msk.bf16.mxu1 %vm3456_vm0, %v3455_v0 }
  0xd5   : > { %2910 = vmatprep.subr.bf16.mxu1 %v3455_v0  ;;  %2904 = vmatprep.subr.bf16.mxu0 %v3455_v0 }
  0xda   : > { %2895 = vmatmul.mubr.msk.bf16.vlgmr.msra.gmra.mxu0 %vm437_vm1, %v3132_v9  ;;  %2901 = vmatmul.mubr.msk.bf16.vlgmr.msra.gmra.mxu1 %vm437_vm1, %v3132_v9 }
  0xdb   : > { %2905 = vmatpush3.bf16.msra.mxu0 %v3766_v1  ;;  %2911 = vmatpush3.bf16.msra.mxu1 %v3769_v2 }
  0xdc   : > { %2906 = vmatprep.mubr.msk.bf16.mxu0 %vm3456_vm0, %v3455_v0  ;;  %2912 = vmatprep.mubr.msk.bf16.mxu1 %vm3456_vm0, %v3455_v0 }
  0xdd   : > { %2922 = vmatprep.subr.bf16.mxu1 %v3455_v0  ;;  %2916 = vmatprep.subr.bf16.mxu0 %v3455_v0 }
  0xe2   : > { %2907 = vmatmul.mubr.msk.bf16.vlgmr.msra.gmra.mxu0 %vm437_vm1, %v3133_v10  ;;  %2913 = vmatmul.mubr.msk.bf16.vlgmr.msra.gmra.mxu1 %vm437_vm1, %v3133_v10 }
  0xe3   : > { %2917 = vmatpush3.bf16.msra.mxu0 %v3766_v1  ;;  %2923 = vmatpush3.bf16.msra.mxu1 %v3769_v2 }
  0xe4   : > { %2918 = vmatprep.mubr.msk.bf16.mxu0 %vm3456_vm0, %v3455_v0  ;;  %2924 = vmatprep.mubr.msk.bf16.mxu1 %vm3456_vm0, %v3455_v0 }
  0xe5   : > { %2928 = vmatprep.subr.bf16.mxu0 %v3455_v0  ;;  %2934 = vmatprep.subr.bf16.mxu1 %v3455_v0 }
  0xea   : > { %2919 = vmatmul.mubr.msk.bf16.vlgmr.msra.gmra.mxu0 %vm437_vm1, %v3134_v13  ;;  %2925 = vmatmul.mubr.msk.bf16.vlgmr.msra.gmra.mxu1 %vm437_vm1, %v3134_v13 }
  0xeb   : > { %2929 = vmatpush3.bf16.xpose.msra.mxu0 %v1448_v14  ;;  %2935 = vmatpush3.bf16.xpose.msra.mxu1 %v1505_v15 }
  0xec   : > { %2930 = vmatprep.mubr.msk.bf16.mxu0 %vm3456_vm0, %v3455_v0  ;;  %2936 = vmatprep.mubr.msk.bf16.mxu1 %vm3456_vm0, %v3455_v0 }
  0xed   : > { %2940 = vmatprep.subr.bf16.mxu0 %v3455_v0  ;;  %2946 = vmatprep.subr.bf16.mxu1 %v3455_v0 }
  0xf2   : > { %2931 = vmatmul.mubr.msk.bf16.vlgmr.msra.gmra.mxu0 %vm1443_vm2, %v3876_v16  ;;  %2937 = vmatmul.mubr.msk.bf16.vlgmr.msra.gmra.mxu1 %vm1443_vm2, %v3881_v17 }
  0xf3   : > { %2941 = vmatpush3.bf16.msra.mxu0 %v3766_v1  ;;  %2942 = vmatprep.mubr.msk.bf16.mxu0 %vm3456_vm0, %v3455_v0 }
  0xf4   : > { %2952 = vmatprep.subr.bf16.mxu0 %v3455_v0  ;;  %2947 = vmatpush3.bf16.msra.mxu1 %v3769_v2 }
  0xf5   : > { %2948 = vmatprep.mubr.msk.bf16.mxu1 %vm3456_vm0, %v3455_v0  ;;  %2958 = vmatprep.subr.bf16.mxu1 %v3455_v0 }
 0x16a   : > { %v475_v18 = vpop.f32.mrf.mxu0  ;;  %v522_v19 = vpop.f32.mrf.mxu1 }
 0x16b   : > { %v534_v26 = vmul.f32 %v2667_v24, %v475_v18  ;;  %v536_v32 = vmul.f32 %v2667_v24, %v522_v19 }
 0x16c   : > { %v2824_v20 = vpop.f32.mrf.mxu0  ;;  %v2830_v21 = vpop.f32.mrf.mxu1 }
 0x16e   : > { %v478_v22 = vpop.f32.mrf.mxu0  ;;  %v525_v23 = vpop.f32.mrf.mxu1 }
 0x16f   : > { %v535_v35 = vmul.f32 %v2667_v24, %v478_v22  ;;  %v537_v42 = vmul.f32 %v2667_v24, %v525_v23  ;;  %v2683_v24 = vld [vmem:[#allocation10 + $0x4] ss:$0 sm:$0xff] }
 0x170   : > { %v2825_v25 = vpop.f32.mrf.mxu0  ;;  %v2831_v27 = vpop.f32.mrf.mxu1 }
 0x172   : > { %v587_v29 = vpop.f32.mrf.mxu0  ;;  %v628_v31 = vpop.f32.mrf.mxu1 }
 0x173   : > { %v640_v30 = vmul.f32 %v2671_v28, %v587_v29  ;;  %v642_v33 = vmul.f32 %v2671_v28, %v628_v31 }
 0x174   : > { %v2836_v34 = vpop.f32.mrf.mxu0  ;;  %v2842_v37 = vpop.f32.mrf.mxu1 }
 0x175   : > { %v644_v36 = vadd.f32 %v640_v30, %v534_v26  ;;  %v646_v38 = vadd.f32 %v642_v33, %v536_v32 }
 0x176   : > { %v590_v39 = vpop.f32.mrf.mxu0  ;;  %v631_v41 = vpop.f32.mrf.mxu1 }
 0x177   : > { %v641_v40 = vmul.f32 %v2671_v28, %v590_v39  ;;  %v643_v43 = vmul.f32 %v2671_v28, %v631_v41  ;;  %v2687_v41 = vld [vmem:[#allocation10 + $0x5] ss:$0 sm:$0xff] }
 0x178   : > { %v2837_v44 = vpop.f32.mrf.mxu0  ;;  %v2843_v46 = vpop.f32.mrf.mxu1 }
 0x179   : > { %v645_v45 = vadd.f32 %v641_v40, %v535_v35  ;;  %v647_v48 = vadd.f32 %v643_v43, %v537_v42 }
 0x17a   : > { %v693_v49 = vpop.f32.mrf.mxu0  ;;  %v734_v51 = vpop.f32.mrf.mxu1 }
 0x17b   : > { %v746_v50 = vmul.f32 %v2675_v47, %v693_v49  ;;  %v748_v52 = vmul.f32 %v2675_v47, %v734_v51 }
 0x17c   : > { %v2848_v53 = vpop.f32.mrf.mxu0  ;;  %v2854_v55 = vpop.f32.mrf.mxu1 }
 0x17d   : > { %v750_v54 = vadd.f32 %v746_v50, %v644_v36  ;;  %v752_v56 = vadd.f32 %v748_v52, %v646_v38 }
 0x17e   : > { %v696_v57 = vpop.f32.mrf.mxu0  ;;  %v737_v59 = vpop.f32.mrf.mxu1 }
 0x17f   : > { %v747_v58 = vmul.f32 %v2675_v47, %v696_v57  ;;  %v749_v60 = vmul.f32 %v2675_v47, %v737_v59 }
 0x180   : > { %v2849_v61 = vpop.f32.mrf.mxu0  ;;  %v2855_v63 = vpop.f32.mrf.mxu1 }
 0x181   : > { %v751_v62 = vadd.f32 %v747_v58, %v645_v45  ;;  %v753_v4 = vadd.f32 %v749_v60, %v647_v48  ;;  %v2691_v58 = vld [vmem:[#allocation10 + $0x6] ss:$0 sm:$0xff] }
 0x182   : > { %v799_v5 = vpop.f32.mrf.mxu0  ;;  %v840_v7 = vpop.f32.mrf.mxu1 }
 0x183   : > { %v852_v6 = vmul.f32 %v2679_v3, %v799_v5  ;;  %v854_v8 = vmul.f32 %v2679_v3, %v840_v7 }
 0x184   : > { %v2860_v9 = vpop.f32.mrf.mxu0  ;;  %v2866_v13 = vpop.f32.mrf.mxu1 }
 0x185   : > { %v856_v10 = vadd.f32 %v852_v6, %v750_v54  ;;  %v858_v14 = vadd.f32 %v854_v8, %v752_v56 }
 0x186   : > { %v802_v15 = vpop.f32.mrf.mxu0  ;;  %v843_v19 = vpop.f32.mrf.mxu1 }
 0x187   : > { %v853_v18 = vmul.f32 %v2679_v3, %v802_v15  ;;  %v855_v20 = vmul.f32 %v2679_v3, %v843_v19 }
 0x188   : > { %v2861_v21 = vpop.f32.mrf.mxu0  ;;  %v2867_v23 = vpop.f32.mrf.mxu1 }
 0x189   : > { %v857_v22 = vadd.f32 %v853_v18, %v751_v62  ;;  %v859_v25 = vadd.f32 %v855_v20, %v753_v4 }
 0x18a   : > { %v905_v26 = vpop.f32.mrf.mxu0  ;;  %v946_v28 = vpop.f32.mrf.mxu1 }
 0x18b   : > { %v958_v27 = vmul.f32 %v2683_v24, %v905_v26  ;;  %v960_v29 = vmul.f32 %v2683_v24, %v946_v28 }
 0x18c   : > { %v2872_v30 = vpop.f32.mrf.mxu0  ;;  %v2878_v32 = vpop.f32.mrf.mxu1 }
 0x18d   : > { %v962_v31 = vadd.f32 %v958_v27, %v856_v10  ;;  %v964_v33 = vadd.f32 %v960_v29, %v858_v14  ;;  %v2695_v14 = vld [vmem:[#allocation10 + $0x7] ss:$0 sm:$0xff] }
 0x18e   : > { %v908_v34 = vpop.f32.mrf.mxu0  ;;  %v949_v36 = vpop.f32.mrf.mxu1 }
 0x18f   : > { %v959_v35 = vmul.f32 %v2683_v24, %v908_v34  ;;  %v961_v37 = vmul.f32 %v2683_v24, %v949_v36 }
 0x190   : > { %v2873_v38 = vpop.f32.mrf.mxu0  ;;  %v2879_v40 = vpop.f32.mrf.mxu1 }
 0x191   : > { %v963_v39 = vadd.f32 %v959_v35, %v857_v22  ;;  %v965_v42 = vadd.f32 %v961_v37, %v859_v25 }
 0x192   : > { %v1011_v43 = vpop.f32.mrf.mxu0  ;;  %v1052_v45 = vpop.f32.mrf.mxu1 }
 0x193   : > { %v1064_v44 = vmul.f32 %v2687_v41, %v1011_v43  ;;  %v1066_v46 = vmul.f32 %v2687_v41, %v1052_v45  ;;  %v2751_v45 = vld [vmem:[%s1416_s18 + $0x8] sm:$0xff]  }
 0x194   : > { %v2884_v47 = vpop.f32.mrf.mxu0  ;;  %v2890_v49 = vpop.f32.mrf.mxu1 }
 0x195   : > { %v1068_v48 = vadd.f32 %v1064_v44, %v962_v31  ;;  %v1070_v50 = vadd.f32 %v1066_v46, %v964_v33  ;;  %v2699_v33 = vld [vmem:[#allocation10 + $0x8] ss:$0 sm:$0xff] }
 0x196   : > { %v1014_v51 = vpop.f32.mrf.mxu0  ;;  %v1055_v53 = vpop.f32.mrf.mxu1 }
 0x197   : > { %v1065_v52 = vmul.f32 %v2687_v41, %v1014_v51  ;;  %v1067_v54 = vmul.f32 %v2687_v41, %v1055_v53  ;;  %v3904_v53 = vunpack.c.l.bf16 %v2751_v45 }
 0x198   : > { %v2885_v55 = vpop.f32.mrf.mxu0  ;;  %v2891_v57 = vpop.f32.mrf.mxu1 }
 0x199   : > { %v1069_v56 = vadd.f32 %v1065_v52, %v963_v39  ;;  %v1071_v59 = vadd.f32 %v1067_v54, %v965_v42  ;;  %v2744_v42 = vld [vmem:[%s1416_s18] sm:$0xff]  }
 0x19a   : > { %v1117_v60 = vpop.f32.mrf.mxu0  ;;  %v1158_v62 = vpop.f32.mrf.mxu1 }
 0x19b   : > { %v1170_v61 = vmul.f32 %v2691_v58, %v1117_v60  ;;  %v1172_v63 = vmul.f32 %v2691_v58, %v1158_v62  ;;  %v3911_v60 = vunpack.c.h.bf16 %v2744_v42 }
 0x19c   : > { %v2896_v3 = vpop.f32.mrf.mxu0  ;;  %v2902_v5 = vpop.f32.mrf.mxu1 }
 0x19d   : > { %v1174_v4 = vadd.f32 %v1170_v61, %v1068_v48  ;;  %v1176_v6 = vadd.f32 %v1172_v63, %v1070_v50  ;;  %v3902_v50 = vunpack.c.l.bf16 %v2744_v42 }
 0x19e   : > { %v1120_v7 = vpop.f32.mrf.mxu0  ;;  %v1161_v9 = vpop.f32.mrf.mxu1 }
 0x19f   : > { %v1171_v8 = vmul.f32 %v2691_v58, %v1120_v7  ;;  %v1173_v10 = vmul.f32 %v2691_v58, %v1161_v9 }
 0x1a0   : > { %v2897_v13 = vpop.f32.mrf.mxu0  ;;  %v2903_v18 = vpop.f32.mrf.mxu1 }
 0x1a1   : > { %v1175_v15 = vadd.f32 %v1171_v8, %v1069_v56  ;;  %v1177_v19 = vadd.f32 %v1173_v10, %v1071_v59  ;;  %v3922_v13 = vunpack.c.h.bf16 %v2751_v45 }
 0x1a2   : > { %v1223_v20 = vpop.f32.mrf.mxu0  ;;  %v1264_v22 = vpop.f32.mrf.mxu1 }
 0x1a3   : > { %v1276_v21 = vmul.f32 %v2695_v14, %v1223_v20  ;;  %v1278_v23 = vmul.f32 %v2695_v14, %v1264_v22 }
 0x1a4   : > { %v2908_v24 = vpop.f32.mrf.mxu0  ;;  %v2914_v26 = vpop.f32.mrf.mxu1 }
 0x1a5   : > { %v1280_v25 = vadd.f32 %v1276_v21, %v1174_v4  ;;  %v1282_v27 = vadd.f32 %v1278_v23, %v1176_v6 }
 0x1a6   : > { %v1226_v28 = vpop.f32.mrf.mxu0  ;;  %v1267_v30 = vpop.f32.mrf.mxu1 }
 0x1a7   : > { %v1277_v29 = vmul.f32 %v2695_v14, %v1226_v28  ;;  %v1279_v31 = vmul.f32 %v2695_v14, %v1267_v30 }
 0x1a8   : > { %v2909_v32 = vpop.f32.mrf.mxu0  ;;  %v2915_v35 = vpop.f32.mrf.mxu1 }
 0x1a9   : > { %v1281_v34 = vadd.f32 %v1277_v29, %v1175_v15  ;;  %v1283_v36 = vadd.f32 %v1279_v31, %v1177_v19 }
 0x1aa   : > { %v1329_v37 = vpop.f32.mrf.mxu0  ;;  %v1370_v39 = vpop.f32.mrf.mxu1 }
 0x1ab   : > { %v1382_v38 = vmul.f32 %v2699_v33, %v1329_v37  ;;  %v1384_v40 = vmul.f32 %v2699_v33, %v1370_v39 }
 0x1ac   : > { %v2920_v41 = vpop.f32.mrf.mxu0  ;;  %v2926_v44 = vpop.f32.mrf.mxu1 }
 0x1ad   : > { %v3898_v43 = vadd.f32 %v1382_v38, %v1280_v25  ;;  %v3900_v46 = vadd.f32 %v1384_v40, %v1282_v27 }
 0x1ae   : > { %v1332_v47 = vpop.f32.mrf.mxu0  ;;  %v1373_v49 = vpop.f32.mrf.mxu1 }
 0x1af   : > { %v1383_v48 = vmul.f32 %v2699_v33, %v1332_v47  ;;  %v1385_v51 = vmul.f32 %v2699_v33, %v1373_v49 }
 0x1b0   : > { %v2921_v52 = vpop.f32.mrf.mxu0  ;;  %v2927_v55 = vpop.f32.mrf.mxu1 }
 0x1b1   : > { %v3906_v54 = vadd.f32 %v1383_v48, %v1281_v34  ;;  %v3908_v56 = vadd.f32 %v1385_v51, %v1283_v36 }
 0x1b2   : > { %v1484_v57 = vpop.f32.mrf.mxu0  ;;  %v1541_v59 = vpop.f32.mrf.mxu1 }
 0x1b3   : > { %v1485_v58 = vadd.f32 %v3902_v50, %v1484_v57  ;;  %v1542_v61 = vadd.f32 %v3904_v53, %v1541_v59 }
 0x1b4   : > { %v2932_v62 = vpop.f32.mrf.mxu0  ;;  %v2938_v63 = vpop.f32.mrf.mxu1 }
 0x1b5   : > { %v1548_v3 = vsel %vm437_vm1, %v1485_v58, -inf  ;;  %v1554_v4 = vsel %vm437_vm1, %v1542_v61, -inf }
 0x1b6   : > { %1549 = vmax.xlane.f32.xlu0 %v1548_v3  ;;  %v1487_v5 = vpop.f32.mrf.mxu0  ;;  %1555 = vmax.xlane.f32.xlu1 %v1554_v4  ;;  %v1544_v6 = vpop.f32.mrf.mxu1 }
 0x1b7   : > { %v1488_v7 = vadd.f32 %v3911_v60, %v1487_v5  ;;  %v1545_v14 = vadd.f32 %v3922_v13, %v1544_v6 }
 0x1b8   : > { %v2933_v8 = vpop.f32.mrf.mxu0  ;;  %v2939_v9 = vpop.f32.mrf.mxu1 }
 0x1b9   : > { %v1551_v10 = vsel %vm437_vm1, %v1488_v7, -inf  ;;  %v1557_v15 = vsel %vm437_vm1, %v1545_v14, -inf }
 0x1ba   : > { %1552 = vmax.xlane.f32.xlu0 %v1551_v10 }
 0x1c7   : > { %1735 = vrot.lane.b32.xlu1 %v3860_v12, %s3457_s2 }
 0x1d0   : > { %1684 = vrot.lane.b32.xlu0 %v3853_v11, %s3457_s2 }
 0x1eb   : > { %1558 = vmax.xlane.f32.xlu1 %v1557_v15 }
 0x1fc   : > { %1682 = vrot.lane.b32.xlu1 %v3876_v16, %s3457_s2 }
 0x200   : > { %1733 = vrot.lane.b32.xlu1 %v3881_v17, %s3457_s2 }
 0x23f   : > { %v1550_v18 = vpop.xlane.xlu0 %1549  ;;  %v1556_v29 = vpop.xlane.xlu1 %1555 }
 0x240   : > { %v1560_v19 = vsub.f32 %v1485_v58, %v1550_v18  ;;  %v1562_v30 = vsub.f32 %v1542_v61, %v1556_v29 }
 0x242   : > { %v1564_v20 = vmul.f32 1.442695, %v1560_v19  ;;  %v1568_v32 = vmul.f32 1.442695, %v1562_v30 }
 0x243   : > { %v1553_v21 = vpop.xlane.xlu0 %1552  ;;  %v1736_v31 = vpop.permute.xlu1 %1735 }
 0x244   : > { %v1561_v22 = vsub.f32 %v1488_v7, %v1553_v21  ;;  %3139 = vpow2.f32 %v1564_v20  ;;  %v1741_v40 = vsel %vm1443_vm2, %v1736_v31, 0 }
 0x246   : > { %v1566_v23 = vmul.f32 1.442695, %v1561_v22 }
 0x247   : > { %v1685_v24 = vpop.permute.xlu0 %1684 }
 0x248   : > { %3141 = vpow2.f32 %v1566_v23  ;;  %v1690_v28 = vsel %vm1443_vm2, %v1685_v24, 0 }
 0x249   : > { %3143 = vpow2.f32 %v1568_v32 }
 0x251   : > { %v3930_v25 = vpop.eup %3139 }
 0x255   : > { %v3932_v26 = vpop.eup %3141 }
 0x256   : > { %v1584_v27 = vpack.c.bf16 %v3932_v26, %v3930_v25  ;;  %v3944_v37 = vpop.eup %3143 }
 0x258   : > { %2943 = vmatmul.mubr.msk.bf16.vlgmr.msra.gmra.mxu0 %vm437_vm1, %v1584_v27 }
 0x259   : > { %2953 = vmatpush3.bf16.xpose.msra.mxu0 %v1690_v28  ;;  %2954 = vmatprep.mubr.msk.bf16.mxu0 %vm3456_vm0, %v3455_v0 }
 0x25a   : > { %2964 = vmatprep.subr.bf16.mxu0 %v3455_v0 }
 0x274   : > { %v1559_v33 = vpop.xlane.xlu1 %1558 }
 0x275   : > { %v1563_v34 = vsub.f32 %v1545_v14, %v1559_v33 }
 0x277   : > { %v1570_v35 = vmul.f32 1.442695, %v1563_v34 }
 0x278   : > { %v1683_v36 = vpop.permute.xlu1 %1682 }
 0x279   : > { %3145 = vpow2.f32 %v1570_v35  ;;  %2955 = vmatmul.mubr.msk.bf16.vlgmr.msra.gmra.mxu0 %vm1443_vm2, %v1683_v36 }
 0x27a   : > { %2966 = vmatprep.mubr.msk.bf16.mxu0 %vm3456_vm0, %v3455_v0 }
 0x27c   : > { %v1734_v41 = vpop.permute.xlu1 %1733 }
 0x286   : > { %v3946_v38 = vpop.eup %3145 }
 0x287   : > { %v1585_v39 = vpack.c.bf16 %v3946_v38, %v3944_v37 }
 0x289   : > { %2949 = vmatmul.mubr.msk.bf16.vlgmr.msra.gmra.mxu1 %vm437_vm1, %v1585_v39 }
 0x28a   : > { %2959 = vmatpush3.bf16.xpose.msra.mxu1 %v1741_v40  ;;  %2960 = vmatprep.mubr.msk.bf16.mxu1 %vm3456_vm0, %v3455_v0 }
 0x28b   : > { %2970 = vmatprep.subr.bf16.mxu1 %v3455_v0 }
 0x291   : > { %2961 = vmatmul.mubr.msk.bf16.vlgmr.msra.gmra.mxu1 %vm1443_vm2, %v1734_v41 }
 0x292   : > { %2972 = vmatprep.mubr.msk.bf16.mxu1 %vm3456_vm0, %v3455_v0 }
 0x318   : > { %v3958_v42 = vpop.f32.mrf.mxu0 }
 0x31a   : > { %v2944_v44 = vpop.f32.mrf.mxu0 }
 0x31c   : > { %v3960_v45 = vpop.f32.mrf.mxu0 }
 0x31e   : > { %v2945_v47 = vpop.f32.mrf.mxu0 }
 0x339   : > { %v1726_v48 = vpop.f32.mrf.mxu0 }
 0x33a   : > { %v1727_v49 = vadd.f32 %v3902_v50, %v1726_v48 }
 0x33b   : > { %v2956_v51 = vpop.f32.mrf.mxu0 }
 0x33c   : > { %v1784_v52 = vsel %vm437_vm1, %v1727_v49, -inf }
 0x33d   : > { %1785 = vmax.xlane.f32.xlu0 %v1784_v52  ;;  %v1729_v55 = vpop.f32.mrf.mxu0 }
 0x33e   : > { %v1730_v57 = vadd.f32 %v3911_v60, %v1729_v55 }
 0x33f   : > { %v2957_v58 = vpop.f32.mrf.mxu0 }
 0x340   : > { %v1787_v59 = vsel %vm437_vm1, %v1730_v57, -inf }
 0x341   : > { %1788 = vmax.xlane.f32.xlu1 %v1787_v59 }
 0x349   : > { %v3966_v61 = vpop.f32.mrf.mxu1 }
 0x34b   : > { %v2950_v62 = vpop.f32.mrf.mxu1 }
 0x34d   : > { %v3968_v63 = vpop.f32.mrf.mxu1 }
 0x34f   : > { %v2951_v3 = vpop.f32.mrf.mxu1 }
 0x351   : > { %v1777_v4 = vpop.f32.mrf.mxu1 }
 0x352   : > { %v1778_v5 = vadd.f32 %v3904_v53, %v1777_v4  ;;  %1869 = vrot.lane.b32.xlu1 %v3769_v2, %s3457_s2 }
 0x353   : > { %v2962_v6 = vpop.f32.mrf.mxu1 }
 0x354   : > { %v1790_v7 = vsel %vm437_vm1, %v1778_v5, -inf }
 0x355   : > { %v1780_v8 = vpop.f32.mrf.mxu1  ;;  %1791 = vmax.xlane.f32.xlu0 %v1790_v7 }
 0x356   : > { %v1781_v9 = vadd.f32 %v3922_v13, %v1780_v8  ;;  %1926 = vrot.lane.b32.xlu1 %v3853_v11, %s3458_s10 }
 0x357   : > { %v2963_v10 = vpop.f32.mrf.mxu1 }
 0x358   : > { %v1793_v14 = vsel %vm437_vm1, %v1781_v9, -inf }
 0x359   : > { %1794 = vmax.xlane.f32.xlu0 %v1793_v14 }
 0x35a   : > { %1977 = vrot.lane.b32.xlu1 %v3860_v12, %s3458_s10 }
 0x35e   : > { %1975 = vrot.lane.b32.xlu1 %v3881_v17, %s3458_s10 }
 0x36f   : > { %1822 = vrot.lane.b32.xlu0 %v3766_v1, %s3457_s2 }
 0x373   : > { %1924 = vrot.lane.b32.xlu0 %v3876_v16, %s3458_s10 }
 0x3c6   : > { %v1786_v19 = vpop.xlane.xlu0 %1785 }
 0x3c7   : > { %v1796_v21 = vsub.f32 %v1727_v49, %v1786_v19 }
 0x3c9   : > { %v1800_v23 = vmul.f32 1.442695, %v1796_v21 }
 0x3ca   : > { %v1789_v15 = vpop.xlane.xlu1 %1788 }
 0x3cb   : > { %v1797_v20 = vsub.f32 %v1730_v57, %v1789_v15 }
 0x3cd   : > { %v1802_v22 = vmul.f32 1.442695, %v1797_v20 }
 0x3ce   : > { %v1870_v18 = vpop.permute.xlu1 %1869 }
 0x3cf   : > { %2971 = vmatpush3.bf16.msra.mxu1 %v1870_v18  ;;  %3147 = vpow2.f32 %v1802_v22 }
 0x3d0   : > { %2982 = vmatprep.subr.bf16.mxu1 %v3455_v0  ;;  %3149 = vpow2.f32 %v1800_v23 }
 0x3d2   : > { %v1927_v33 = vpop.permute.xlu1 %1926 }
 0x3d3   : > { %v1932_v36 = vsel %vm1443_vm2, %v1927_v33, 0 }
 0x3d6   : > { %v1978_v41 = vpop.permute.xlu1 %1977 }
 0x3d7   : > { %v1983_v48 = vsel %vm1443_vm2, %v1978_v41, 0 }
 0x3da   : > { %v1976_v51 = vpop.permute.xlu1 %1975 }
 0x3dc   : > { %v3987_v31 = vpop.eup %3147 }
 0x3dd   : > { %v3989_v35 = vpop.eup %3149 }
 0x3de   : > { %v1792_v24 = vpop.xlane.xlu0 %1791  ;;  %v1820_v39 = vpack.c.bf16 %v3987_v31, %v3989_v35 }
 0x3df   : > { %v1798_v27 = vsub.f32 %v1778_v5, %v1792_v24 }
 0x3e1   : > { %v1804_v28 = vmul.f32 1.442695, %v1798_v27 }
 0x3e2   : > { %v1795_v29 = vpop.xlane.xlu0 %1794 }
 0x3e3   : > { %v1799_v30 = vsub.f32 %v1781_v9, %v1795_v29  ;;  %3151 = vpow2.f32 %v1804_v28 }
 0x3e5   : > { %v1806_v32 = vmul.f32 1.442695, %v1799_v30 }
 0x3e6   : > { %v1823_v34 = vpop.permute.xlu0 %1822 }
 0x3e7   : > { %3153 = vpow2.f32 %v1806_v32  ;;  %2965 = vmatpush3.bf16.msra.mxu0 %v1823_v34 }
 0x3e8   : > { %2976 = vmatprep.subr.bf16.mxu0 %v3455_v0 }
 0x3ea   : > { %2967 = vmatmul.mubr.msk.bf16.vlgmr.msra.gmra.mxu0 %vm437_vm1, %v1820_v39  ;;  %v1925_v40 = vpop.permute.xlu0 %1924 }
 0x3eb   : > { %2977 = vmatpush3.bf16.xpose.msra.mxu0 %v1932_v36  ;;  %2978 = vmatprep.mubr.msk.bf16.mxu0 %vm3456_vm0, %v3455_v0 }
 0x3ec   : > { %2988 = vmatprep.subr.bf16.mxu0 %v3455_v0 }
 0x3f0   : > { %v4000_v44 = vpop.eup %3151 }
 0x3f2   : > { %2979 = vmatmul.mubr.msk.bf16.vlgmr.msra.gmra.mxu0 %vm1443_vm2, %v1925_v40 }
 0x3f3   : > { %2990 = vmatprep.mubr.msk.bf16.mxu0 %vm3456_vm0, %v3455_v0 }
 0x3f4   : > { %v4004_v47 = vpop.eup %3153 }
 0x3f5   : > { %v1821_v49 = vpack.c.bf16 %v4004_v47, %v4000_v44 }
 0x3f7   : > { %2973 = vmatmul.mubr.msk.bf16.vlgmr.msra.gmra.mxu1 %vm437_vm1, %v1821_v49 }
 0x3f8   : > { %2983 = vmatpush3.bf16.xpose.msra.mxu1 %v1983_v48  ;;  %2984 = vmatprep.mubr.msk.bf16.mxu1 %vm3456_vm0, %v3455_v0 }
 0x3f9   : > { %2994 = vmatprep.subr.bf16.mxu1 %v3455_v0 }
 0x3ff   : > { %2985 = vmatmul.mubr.msk.bf16.vlgmr.msra.gmra.mxu1 %vm1443_vm2, %v1976_v51 }
 0x400   : > { %2996 = vmatprep.mubr.msk.bf16.mxu1 %vm3456_vm0, %v3455_v0 }
 0x4aa   : > { %v4016_v52 = vpop.f32.mrf.mxu0 }
 0x4ac   : > { %v2968_v55 = vpop.f32.mrf.mxu0 }
 0x4ae   : > { %v4018_v57 = vpop.f32.mrf.mxu0 }
 0x4b0   : > { %v2969_v58 = vpop.f32.mrf.mxu0 }
 0x4b2   : > { %v1968_v59 = vpop.f32.mrf.mxu0 }
 0x4b3   : > { %v1969_v62 = vadd.f32 %v3902_v50, %v1968_v59 }
 0x4b4   : > { %v2980_v3 = vpop.f32.mrf.mxu0 }
 0x4b5   : > { %v2026_v4 = vsel %vm437_vm1, %v1969_v62, -inf }
 0x4b6   : > { %2027 = vmax.xlane.f32.xlu0 %v2026_v4  ;;  %v1971_v5 = vpop.f32.mrf.mxu0 }
 0x4b7   : > { %v1972_v6 = vadd.f32 %v3911_v60, %v1971_v5  ;;  %v4023_v7 = vpop.f32.mrf.mxu1 }
 0x4b8   : > { %v2981_v8 = vpop.f32.mrf.mxu0 }
 0x4b9   : > { %v2974_v9 = vpop.f32.mrf.mxu1  ;;  %v2029_v10 = vsel %vm437_vm1, %v1972_v6, -inf }
 0x4ba   : > { %2030 = vmax.xlane.f32.xlu1 %v2029_v10 }
 0x4bb   : > { %v4026_v14 = vpop.f32.mrf.mxu1 }
 0x4bd   : > { %v2975_v15 = vpop.f32.mrf.mxu1 }
 0x4bf   : > { %v2019_v18 = vpop.f32.mrf.mxu1 }
 0x4c0   : > { %v2020_v19 = vadd.f32 %v3904_v53, %v2019_v18 }
 0x4c1   : > { %v2986_v20 = vpop.f32.mrf.mxu1 }
 0x4c2   : > { %v2032_v21 = vsel %vm437_vm1, %v2020_v19, -inf }
 0x4c3   : > { %v2022_v22 = vpop.f32.mrf.mxu1  ;;  %2033 = vmax.xlane.f32.xlu0 %v2032_v21 }
 0x4c4   : > { %v2023_v23 = vadd.f32 %v3922_v13, %v2022_v22 }
 0x4c5   : > { %v2987_v24 = vpop.f32.mrf.mxu1 }
 0x4c6   : > { %v2035_v27 = vsel %vm437_vm1, %v2023_v23, -inf }
 0x4c7   : > { %2036 = vmax.xlane.f32.xlu0 %v2035_v27 }
 0x4cb   : > { %2111 = vrot.lane.b32.xlu1 %v3769_v2, %s3458_s10 }
 0x4cf   : > { %2168 = vrot.lane.b32.xlu1 %v3853_v11, %s3459_s24 }
 0x4d3   : > { %2219 = vrot.lane.b32.xlu1 %v3860_v12, %s3459_s24 }
 0x4d7   : > { %2217 = vrot.lane.b32.xlu1 %v3881_v17, %s3459_s24 }
 0x4dd   : > { %2064 = vrot.lane.b32.xlu0 %v3766_v1, %s3458_s10 }
 0x4e1   : > { %2166 = vrot.lane.b32.xlu0 %v3876_v16, %s3459_s24 }
 0x53f   : > { %v2028_v28 = vpop.xlane.xlu0 %2027 }
 0x540   : > { %v2038_v29 = vsub.f32 %v1969_v62, %v2028_v28 }
 0x542   : > { %v2042_v30 = vmul.f32 1.442695, %v2038_v29 }
 0x543   : > { %v2031_v2 = vpop.xlane.xlu1 %2030 }
 0x544   : > { %v2039_v32 = vsub.f32 %v1972_v6, %v2031_v2  ;;  %3155 = vpow2.f32 %v2042_v30 }
 0x546   : > { %v2044_v33 = vmul.f32 1.442695, %v2039_v32 }
 0x547   : > { %v2112_v11 = vpop.permute.xlu1 %2111 }
 0x548   : > { %3157 = vpow2.f32 %v2044_v33  ;;  %2995 = vmatpush3.bf16.msra.mxu1 %v2112_v11 }
 0x549   : > { %3006 = vmatprep.subr.bf16.mxu1 %v3455_v0 }
 0x54b   : > { %v2169_v40 = vpop.permute.xlu1 %2168 }
 0x54c   : > { %v2034_v12 = vpop.xlane.xlu0 %2033  ;;  %v2174_v49 = vsel %vm1443_vm2, %v2169_v40, 0  ;;  %v1814_v40 = vsel %vm437_vm1, %v4000_v44, 0.0 }
 0x54d   : > { %v2040_v17 = vsub.f32 %v2020_v19, %v2034_v12 }
 0x54f   : > { %v2046_v34 = vmul.f32 1.442695, %v2040_v17  ;;  %v2220_v58 = vpop.permute.xlu1 %2219  ;;  %v3203_v17 = vld [vmem:[%s3753_s14 + $0x8] sm:$0xff]  }
 0x550   : > { %v2037_v36 = vpop.xlane.xlu0 %2036  ;;  %v2225_v3 = vsel %vm1443_vm2, %v2220_v58, 0 }
 0x551   : > { %v2041_v1 = vsub.f32 %v2023_v23, %v2037_v36  ;;  %v4045_v16 = vpop.eup %3155  ;;  %3159 = vpow2.f32 %v2046_v34  ;;  %v3204_v34 = vld [vmem:[%s3753_s14] sm:$0xff]   ;;  %v1817_v36 = vsel %vm437_vm1, %v4004_v47, 0.0 }
 0x553   : > { %v2048_v39 = vmul.f32 1.442695, %v2041_v1  ;;  %v2218_v5 = vpop.permute.xlu1 %2217 }
 0x554   : > { %v2065_v41 = vpop.permute.xlu0 %2064 }
 0x555   : > { %v3158_v48 = vpop.eup %3157  ;;  %3161 = vpow2.f32 %v2048_v39  ;;  %2989 = vmatpush3.bf16.msra.mxu0 %v2065_v41  ;;  %v1811_v39 = vsel %vm437_vm1, %v3987_v31, 0.0 }
 0x556   : > { %v2062_v51 = vpack.c.bf16 %v3158_v48, %v4045_v16  ;;  %3000 = vmatprep.subr.bf16.mxu0 %v3455_v0 }
 0x558   : > { %2991 = vmatmul.mubr.msk.bf16.vlgmr.msra.gmra.mxu0 %vm437_vm1, %v2062_v51  ;;  %v2167_v55 = vpop.permute.xlu0 %2166 }
 0x559   : > { %3001 = vmatpush3.bf16.xpose.msra.mxu0 %v2174_v49  ;;  %3002 = vmatprep.mubr.msk.bf16.mxu0 %vm3456_vm0, %v3455_v0 }
 0x55a   : > { %3012 = vmatprep.subr.bf16.mxu0 %v3455_v0 }
 0x55e   : > { %v3160_v59 = vpop.eup %3159 }
 0x55f   : > { %v2056_v47 = vsel %vm437_vm1, %v3160_v59, 0.0 }
 0x560   : > { %3003 = vmatmul.mubr.msk.bf16.vlgmr.msra.gmra.mxu0 %vm1443_vm2, %v2167_v55 }
 0x561   : > { %3014 = vmatprep.mubr.msk.bf16.mxu0 %vm3456_vm0, %v3455_v0 }
 0x562   : > { %v3162_v62 = vpop.eup %3161 }
 0x563   : > { %v2063_v4 = vpack.c.bf16 %v3162_v62, %v3160_v59  ;;  %v2059_v1 = vsel %vm437_vm1, %v3162_v62, 0.0 }
 0x565   : > { %2997 = vmatmul.mubr.msk.bf16.vlgmr.msra.gmra.mxu1 %vm437_vm1, %v2063_v4 }
 0x566   : > { %3007 = vmatpush3.bf16.xpose.msra.mxu1 %v2225_v3  ;;  %3008 = vmatprep.mubr.msk.bf16.mxu1 %vm3456_vm0, %v3455_v0 }
 0x567   : > { %3018 = vmatprep.subr.bf16.mxu1 %v3455_v0 }
 0x56d   : > { %3009 = vmatmul.mubr.msk.bf16.vlgmr.msra.gmra.mxu1 %vm1443_vm2, %v2218_v5 }
 0x56e   : > { %3020 = vmatprep.mubr.msk.bf16.mxu1 %vm3456_vm0, %v3455_v0 }
 0x618   : > { %v4065_v6 = vpop.f32.mrf.mxu0 }
 0x61a   : > { %v2992_v8 = vpop.f32.mrf.mxu0 }
 0x61c   : > { %v4067_v9 = vpop.f32.mrf.mxu0 }
 0x61e   : > { %v2993_v10 = vpop.f32.mrf.mxu0 }
 0x620   : > { %v2210_v15 = vpop.f32.mrf.mxu0 }
 0x621   : > { %v2211_v18 = vadd.f32 %v3902_v50, %v2210_v15 }
 0x622   : > { %v3004_v19 = vpop.f32.mrf.mxu0 }
 0x623   : > { %v2268_v20 = vsel %vm437_vm1, %v2211_v18, -inf }
 0x624   : > { %2269 = vmax.xlane.f32.xlu0 %v2268_v20  ;;  %v2213_v21 = vpop.f32.mrf.mxu0 }
 0x625   : > { %v2214_v22 = vadd.f32 %v3911_v60, %v2213_v21  ;;  %v4072_v23 = vpop.f32.mrf.mxu1 }
 0x626   : > { %v3005_v24 = vpop.f32.mrf.mxu0 }
 0x627   : > { %v2998_v0 = vpop.f32.mrf.mxu1  ;;  %v2271_v27 = vsel %vm437_vm1, %v2214_v22, -inf  ;;  %v1572_v24 = vsel %vm437_vm1, %v3930_v25, 0.0 }
 0x628   : > { %2272 = vmax.xlane.f32.xlu1 %v2271_v27 }
 0x629   : > { %v4075_v28 = vpop.f32.mrf.mxu1 }
 0x62b   : > { %v2999_v29 = vpop.f32.mrf.mxu1 }
 0x62c   : > { %v1578_v29 = vsel %vm437_vm1, %v3944_v37, 0.0 }
 0x62d   : > { %v2261_v50 = vpop.f32.mrf.mxu1 }
 0x62e   : > { %v2262_v30 = vadd.f32 %v3904_v53, %v2261_v50  ;;  %v1808_v53 = vsel %vm437_vm1, %v3989_v35, 0.0  ;;  %v2050_v35 = vsel %vm437_vm1, %v4045_v16, 0.0  ;;  %v1575_v50 = vsel %vm437_vm1, %v3932_v26, 0.0 }
 0x62f   : > { %v3010_v2 = vpop.f32.mrf.mxu1 }
 0x630   : > { %v2274_v32 = vsel %vm437_vm1, %v2262_v30, -inf }
 0x631   : > { %v2264_v33 = vpop.f32.mrf.mxu1  ;;  %2275 = vmax.xlane.f32.xlu0 %v2274_v32 }
 0x632   : > { %v2265_v60 = vadd.f32 %v3922_v13, %v2264_v33  ;;  %v2053_v13 = vsel %vm437_vm1, %v3158_v48, 0.0 }
 0x633   : > { %v3011_v11 = vpop.f32.mrf.mxu1 }
 0x634   : > { %v2277_v12 = vsel %vm437_vm1, %v2265_v60, -inf }
 0x635   : > { %2278 = vmax.xlane.f32.xlu0 %v2277_v12 }
 0x639   : > { %2353 = vrot.lane.b32.xlu1 %v3203_v17, %s3459_s24 }
 0x64b   : > { %2306 = vrot.lane.b32.xlu0 %v3204_v34, %s3459_s24 }
 0x65d   : > { %1809 = vadd.xlane.f32.xlu1 %v1808_v53 }
 0x661   : > { %1818 = vadd.xlane.f32.xlu1 %v1817_v36 }
 0x665   : > { %2054 = vadd.xlane.f32.xlu1 %v2053_v13 }
 0x669   : > { %2060 = vadd.xlane.f32.xlu1 %v2059_v1 }
 0x66a   : > { %1812 = vadd.xlane.f32.xlu0 %v1811_v39 }
 0x66e   : > { %1815 = vadd.xlane.f32.xlu0 %v1814_v40 }
 0x672   : > { %2051 = vadd.xlane.f32.xlu0 %v2050_v35 }
 0x676   : > { %2057 = vadd.xlane.f32.xlu0 %v2056_v47 }
 0x6ad   : > { %v2270_v41 = vpop.xlane.xlu0 %2269 }
 0x6ae   : > { %v2280_v48 = vsub.f32 %v2211_v18, %v2270_v41 }
 0x6b0   : > { %v2284_v49 = vmul.f32 1.442695, %v2280_v48 }
 0x6b1   : > { %v2273_v51 = vpop.xlane.xlu1 %2272 }
 0x6b2   : > { %3163 = vpow2.f32 %v2284_v49  ;;  %v2281_v55 = vsub.f32 %v2214_v22, %v2273_v51 }
 0x6b4   : > { %v2286_v58 = vmul.f32 1.442695, %v2281_v55 }
 0x6b5   : > { %v2354_v31 = vpop.permute.xlu1 %2353 }
 0x6b6   : > { %3165 = vpow2.f32 %v2286_v58  ;;  %3019 = vmatpush3.bf16.msra.mxu1 %v2354_v31 }
 0x6ba   : > { %v2276_v62 = vpop.xlane.xlu0 %2275 }
 0x6bb   : > { %v2282_v44 = vsub.f32 %v2262_v30, %v2276_v62  ;;  %v1581_v30 = vsel %vm437_vm1, %v3946_v38, 0.0 }
 0x6bd   : > { %v2288_v3 = vmul.f32 1.442695, %v2282_v44 }
 0x6be   : > { %v2279_v4 = vpop.xlane.xlu0 %2278 }
 0x6bf   : > { %v3164_v5 = vpop.eup %3163  ;;  %3167 = vpow2.f32 %v2288_v3  ;;  %v2283_v16 = vsub.f32 %v2265_v60, %v2279_v4 }
 0x6c0   : > { %v2292_v59 = vsel %vm437_vm1, %v3164_v5, 0.0 }
 0x6c1   : > { %v2290_v8 = vmul.f32 1.442695, %v2283_v16  ;;  %2293 = vadd.xlane.f32.xlu0 %v2292_v59 }
 0x6c2   : > { %v2307_v10 = vpop.permute.xlu0 %2306 }
 0x6c3   : > { %v3166_v15 = vpop.eup %3165  ;;  %3169 = vpow2.f32 %v2290_v8  ;;  %3013 = vmatpush3.bf16.msra.mxu0 %v2307_v10 }
 0x6c4   : > { %v2295_v18 = vsel %vm437_vm1, %v3166_v15, 0.0  ;;  %v2304_v19 = vpack.c.bf16 %v3166_v15, %v3164_v5 }
 0x6c5   : > { %2296 = vadd.xlane.f32.xlu1 %v2295_v18 }
 0x6c6   : > { %3015 = vmatmul.mubr.msk.bf16.vlgmr.msra.gmra.mxu0 %vm437_vm1, %v2304_v19 }
 0x6cc   : > { %v3168_v20 = vpop.eup %3167 }
 0x6cd   : > { %v2298_v21 = vsel %vm437_vm1, %v3168_v20, 0.0 }
 0x6ce   : > { %2299 = vadd.xlane.f32.xlu0 %v2298_v21 }
 0x6d0   : > { %v3170_v22 = vpop.eup %3169 }
 0x6d1   : > { %v2301_v0 = vsel %vm437_vm1, %v3170_v22, 0.0  ;;  %v2305_v27 = vpack.c.bf16 %v3170_v22, %v3168_v20 }
 0x6d2   : > { %1573 = vadd.xlane.f32.xlu0 %v1572_v24  ;;  %2302 = vadd.xlane.f32.xlu1 %v2301_v0 }
 0x6d3   : > { %3021 = vmatmul.mubr.msk.bf16.vlgmr.msra.gmra.mxu1 %vm437_vm1, %v2305_v27 }
 0x6d6   : > { %1579 = vadd.xlane.f32.xlu0 %v1578_v29  ;;  %1576 = vadd.xlane.f32.xlu1 %v1575_v50 }
 0x6da   : > { %1582 = vadd.xlane.f32.xlu1 %v1581_v30 }
 0x6e6   : > { %v1810_v25 = vpop.xlane.xlu1 %1809 }
 0x6e7   : > { %3171 = vrcp.f32 %v1810_v25 }
 0x6ea   : > { %v1819_v2 = vpop.xlane.xlu1 %1818 }
 0x6ee   : > { %v2055_v26 = vpop.xlane.xlu1 %2054 }
 0x6f2   : > { %v2061_v38 = vpop.xlane.xlu1 %2060 }
 0x6f3   : > { %v1813_v32 = vpop.xlane.xlu0 %1812 }
 0x6f4   : > { %v3172_v33 = vpop.eup %3171  ;;  %3173 = vrcp.f32 %v1813_v32 }
 0x6f5   : > { %v1920_v60 = vmul.f32 %v3172_v33, %v4016_v52 }
 0x6f7   : > { %v1816_v11 = vpop.xlane.xlu0 %1815  ;;  %2412 = vrot.lane.b32.xlu0 %v1920_v60, %s3460_s27 }
 0x6f8   : > { %3175 = vrcp.f32 %v1816_v11 }
 0x6f9   : > { %3177 = vrcp.f32 %v1819_v2  ;;  %v2700_v2 = vld [vmem:[%s4207_s6] ss:$0 sm:$0xff] }
 0x6fa   : > { %v1397_v60 = vadd.f32 %v2700_v2, %v3898_v43 }
 0x6fb   : > { %v2052_v37 = vpop.xlane.xlu0 %2051 }
 0x6fc   : > { %3179 = vrcp.f32 %v2052_v37 }
 0x6fd   : > { %3181 = vrcp.f32 %v2055_v26 }
 0x6ff   : > { %v2058_v12 = vpop.xlane.xlu0 %2057 }
 0x700   : > { %3183 = vrcp.f32 %v2058_v12 }
 0x701   : > { %v3174_v17 = vpop.eup %3173  ;;  %3185 = vrcp.f32 %v2061_v38 }
 0x702   : > { %v1921_v34 = vmul.f32 %v3174_v17, %v4018_v57 }
 0x704   : > { %2414 = vrot.lane.b32.xlu1 %v1921_v34, %s3460_s27  ;;  %v1398_v34 = vadd.f32 %v2700_v2, %v3906_v54  ;;  %v1399_v54 = vadd.f32 %v2700_v2, %v3900_v46 }
 0x705   : > { %v3176_v52 = vpop.eup %3175 }
 0x706   : > { %v1922_v53 = vmul.f32 %v3176_v52, %v4023_v7  ;;  %v3178_v36 = vpop.eup %3177 }
 0x707   : > { %v1923_v39 = vmul.f32 %v3178_v36, %v4026_v14 }
 0x708   : > { %2416 = vrot.lane.b32.xlu1 %v1922_v53, %s3460_s27 }
 0x709   : > { %v3180_v13 = vpop.eup %3179 }
 0x70a   : > { %v2162_v1 = vmul.f32 %v3180_v13, %v4065_v6  ;;  %v3182_v40 = vpop.eup %3181 }
 0x70b   : > { %v2163_v47 = vmul.f32 %v3182_v40, %v4067_v9 }
 0x70c   : > { %2428 = vrot.lane.b32.xlu0 %v2162_v1, %s3461_s16  ;;  %2418 = vrot.lane.b32.xlu1 %v1923_v39, %s3460_s27 }
 0x70d   : > { %v3184_v35 = vpop.eup %3183 }
 0x70e   : > { %v2164_v57 = vmul.f32 %v3184_v35, %v4072_v23  ;;  %v3186_v41 = vpop.eup %3185 }
 0x70f   : > { %v2165_v7 = vmul.f32 %v3186_v41, %v4075_v28 }
 0x710   : > { %2432 = vrot.lane.b32.xlu0 %v2164_v57, %s3461_s16  ;;  %2430 = vrot.lane.b32.xlu1 %v2163_v47, %s3461_s16 }
 0x714   : > { %2434 = vrot.lane.b32.xlu1 %v2165_v7, %s3461_s16 }
 0x74a   : > { %v2294_v48 = vpop.xlane.xlu0 %2293 }
 0x74b   : > { %3187 = vrcp.f32 %v2294_v48 }
 0x74e   : > { %v2297_v6 = vpop.xlane.xlu1 %2296 }
 0x74f   : > { %3189 = vrcp.f32 %v2297_v6 }
 0x757   : > { %v2300_v14 = vpop.xlane.xlu0 %2299 }
 0x758   : > { %v3188_v49 = vpop.eup %3187  ;;  %3191 = vrcp.f32 %v2300_v14 }
 0x75b   : > { %v2303_v55 = vpop.xlane.xlu1 %2302  ;;  %v1574_v19 = vpop.xlane.xlu0 %1573 }
 0x75c   : > { %v3190_v9 = vpop.eup %3189  ;;  %3193 = vrcp.f32 %v2303_v55 }
 0x75d   : > { %3195 = vrcp.f32 %v1574_v19 }
 0x75f   : > { %v1577_v15 = vpop.xlane.xlu1 %1576  ;;  %v1580_v21 = vpop.xlane.xlu0 %1579 }
 0x760   : > { %3197 = vrcp.f32 %v1577_v15 }
 0x761   : > { %3199 = vrcp.f32 %v1580_v21 }
 0x763   : > { %v1583_v18 = vpop.xlane.xlu1 %1582 }
 0x764   : > { %3201 = vrcp.f32 %v1583_v18 }
 0x765   : > { %v3192_v28 = vpop.eup %3191 }
 0x769   : > { %v3194_v16 = vpop.eup %3193  ;;  %v2413_v24 = vpop.permute.xlu0 %2412 }
 0x76a   : > { %v3196_v29 = vpop.eup %3195 }
 0x76b   : > { %v1678_v30 = vmul.f32 %v3196_v29, %v3958_v42 }
 0x76d   : > { %v3198_v32 = vpop.eup %3197  ;;  %v2456_v33 = vsel %vm1443_vm2, %v1678_v30, %v2413_v24 }
 0x76e   : > { %v1679_v38 = vmul.f32 %v3198_v32, %v3960_v45  ;;  %v3200_v13 = vpop.eup %3199 }
 0x76f   : > { %v1680_v45 = vmul.f32 %v3200_v13, %v3966_v61  ;;  %v1400_v61 = vadd.f32 %v2700_v2, %v3908_v56 }
 0x771   : > { %v3202_v1 = vpop.eup %3201 }
 0x772   : > { %v1681_v57 = vmul.f32 %v3202_v1, %v3968_v63 }
 0x776   : > { %v2415_v20 = vpop.permute.xlu1 %2414 }
 0x777   : > { %v2457_v17 = vsel %vm1443_vm2, %v1679_v38, %v2415_v20 }
 0x77a   : > { %v2417_v22 = vpop.permute.xlu1 %2416 }
 0x77b   : > { %v2458_v39 = vsel %vm1443_vm2, %v1680_v45, %v2417_v22 }
 0x77e   : > { %v2419_v0 = vpop.permute.xlu1 %2418  ;;  %v2429_v27 = vpop.permute.xlu0 %2428 }
 0x77f   : > { %v2460_v11 = vsel %vm437_vm1, %v2456_v33, %v2429_v27  ;;  %v2459_v7 = vsel %vm1443_vm2, %v1681_v57, %v2419_v0 }
 0x782   : > { %v2431_v50 = vpop.permute.xlu1 %2430  ;;  %v2433_v25 = vpop.permute.xlu0 %2432 }
 0x783   : > { %v2461_v52 = vsel %vm437_vm1, %v2457_v17, %v2431_v50  ;;  %v2462_v40 = vsel %vm437_vm1, %v2458_v39, %v2433_v25 }
 0x786   : > { %v2346_v51 = vpop.f32.mrf.mxu0  ;;  %v2435_v26 = vpop.permute.xlu1 %2434 }
 0x787   : > { %v2404_v58 = vmul.f32 %v3188_v49, %v2346_v51  ;;  %v2463_v48 = vsel %vm437_vm1, %v2459_v7, %v2435_v26 }
 0x788   : > { %v3016_v31 = vpop.f32.mrf.mxu0 }
 0x789   : > { %2444 = vrot.lane.b32.xlu0 %v2404_v58, %s3462_s20 }
 0x78a   : > { %v2349_v23 = vpop.f32.mrf.mxu0 }
 0x78b   : > { %v2405_v62 = vmul.f32 %v3190_v9, %v2349_v23 }
 0x78c   : > { %v3017_v44 = vpop.f32.mrf.mxu0 }
 0x78d   : > { %2446 = vrot.lane.b32.xlu1 %v2405_v62, %s3462_s20 }
 0x793   : > { %v2393_v3 = vpop.f32.mrf.mxu1 }
 0x794   : > { %v2406_v4 = vmul.f32 %v3192_v28, %v2393_v3 }
 0x795   : > { %v3022_v5 = vpop.f32.mrf.mxu1 }
 0x796   : > { %2448 = vrot.lane.b32.xlu0 %v2406_v4, %s3462_s20 }
 0x797   : > { %v2396_v59 = vpop.f32.mrf.mxu1 }
 0x798   : > { %v2407_v8 = vmul.f32 %v3194_v16, %v2396_v59 }
 0x799   : > { %v3023_v10 = vpop.f32.mrf.mxu1 }
 0x79a   : > { %2450 = vrot.lane.b32.xlu1 %v2407_v8, %s3462_s20 }
 0x7fb   : > { %v2445_v37 = vpop.permute.xlu0 %2444 }
 0x7fc   : > { %v2465_v42 = vsel %vm2464_vm3, %v2460_v11, %v2445_v37 }
 0x7fd   : > { %v2469_v12 = vadd.f32 %v2465_v42, %v1397_v60 }
 0x7ff   : > { %2474 = vst.msk [vmem:[%s414_s15] sm:$0xff] %vm2473_vm4, %v2469_v12  ;;  %v2447_v43 = vpop.permute.xlu1 %2446 }
 0x800   : > { %v2466_v53 = vsel %vm2464_vm3, %v2461_v52, %v2447_v43 }
 0x801   : > { %v2470_v36 = vadd.f32 %v2466_v53, %v1398_v34 }
 0x803   : > { %2475 = vst.msk [vmem:[%s414_s15 + $0x8] sm:$0xff] %vm2473_vm4, %v2470_v36 }
 0x808   : > { %v2449_v35 = vpop.permute.xlu0 %2448 }
 0x809   : > { %v2467_v47 = vsel %vm2464_vm3, %v2462_v40, %v2449_v35 }
 0x80a   : > { %v2471_v41 = vadd.f32 %v2467_v47, %v1399_v54 }
 0x80c   : > { %2476 = vst.msk [vmem:[%s414_s15 + $0x10] sm:$0xff] %vm2473_vm4, %v2471_v41  ;;  %v2451_v46 = vpop.permute.xlu1 %2450 }
 0x80d   : > { %v2468_v63 = vsel %vm2464_vm3, %v2463_v48, %v2451_v46 }
 0x80e   : > { %v2472_v6 = vadd.f32 %v2468_v63, %v1400_v61 }
 0x810   : > { %2477 = vst.msk [vmem:[%s414_s15 + $0x18] sm:$0xff] %vm2473_vm4, %v2472_v6 }
 0x811   : > { %3380 = shalt.err (!%p3377_p4)
}
 0x812   : > { %s3381_s30 = scalar_lea.hbm %s4157_s12, 512  ;;  %s3385_s10 = scalar_lea.hbm %s4208_s7, 2048 }
 0x813   : > { %p3382_p2 = scmp.ne.s32.totalorder %s4157_s12, %s3381_s30  ;;  %p3386_p1 = scmp.lt.s32.totalorder %s4157_s12, %s4208_s7 }
 0x814   : > { %p3387_p0 = scmp.lt.s32.totalorder %s3385_s10, %s3381_s30 }
 0x815   : > { %p3383_p12 = pnand %p3382_p2, %p4259_p8 }
 0x816   : > { %p3388_p13 = por %p3387_p0, %p3386_p1 }
 0x817   : > { %p3384_p3 = pneg %p3383_p12 }
 0x819   : > { %p3389_p7 = pnand %p3388_p13, %p3384_p3 }
 0x81b   : > { %3392 = shalt.err (!%p3389_p7)
}
 0x81c   : > { %s3464_s20 = smov 128  }
 0x81d   : > { %3042 = dma.vmem_to_hbm [thread:$0]  (%p4259_p8), %s4151_s9, 512, %s4157_s12, %s2479_s28, %s3464_s20, %s3464_s20, %s3460_s27  }
 0x81e PF: > { %s4260_s19 = sld [smem:[#allocation19_spill]] }
 0x81f   : > { %s4261_s11 = sld [smem:[#allocation17_spill]] }
 0x820   : > { %s4262_s8 = sld [smem:[#allocation22_spill]] }
 0x824   : > { %p3075_p9 = scmp.ge.s32.totalorder %s4260_s19, 2 }
 0x825   : > { %s2508_s15 = sand.u32 1, %s4261_s11  }
 0x826   : > { %p4263_p10 = scmp.ne.s32.totalorder %s4262_s8, 0  ;;  %s2509_s21 = scalar_lea.sflag [#allocation4], %s2508_s15 }
 0x828   : > { %p3065_p6 = pnand %p3075_p9, %p4263_p10 }
 0x82a   : > { %p3066_p5 = pneg %p3065_p6 }
 0x82c   : > { %3426 = dma.done.wait (%p3066_p5), %s2509_s21, 512  }
 0x82d   : > { %3428 = vsyncadd (%p3066_p5), %s2509_s21, 4294966784  ;;  %s4264_s27 = sld [smem:[#allocation20_spill]]  ;;  %s4267_s24 = smov %s3435_s25 }
 0x82e   : > { %s4265_s13 = sld [smem:[#allocation18_spill]] }
 0x82f   : > { %s4266_s26 = sld [smem:[#allocation21_spill]] }
 0x833   : > { %p19_p11 = scmp.ge.s32.totalorder %s4264_s27, 6  }
 0x834   : > { %s4268_s25 = smov %s4265_s13 }
 0x835   :  { %21 = sbr.rel (!%p19_p11) target bundleno = 8 (0x8), region = 135 }
 0x83a   :  { %2514 = vsyncpa [#allocation3], 1 }
 0x83b   :  { %2516 = vsyncpa [#allocation3 + $0x1], 1 }
 0x83c   :  { %2517 = vsyncpa [#allocation6], 1 }
 0x83d   :  { %2518 = vsyncpa [#allocation4], 1 }
 0x83e   :  { %2520 = vsyncpa [#allocation4 + $0x1], 1 }

</bundles_post_ra>
